<compile_context>
chip_gen: v5e
topology: v5e:2x2
jax: 0.10.0
libtpu: 0.0.40
codegen_flags: <defaults>
</compile_context>

<pallas_src>
import math
import functools

import jax
import jax.numpy as jnp
import numpy as np
from jax import lax
from jax.experimental import pallas as pl
from jax.experimental.pallas import tpu as pltpu


def mab_kernel(batch_block, num_heads, ds, scale, mm_dtype,
               q_ref, k_ref,
               wqt_ref, bq_ref, wkt_ref, bk_ref,
               wv1t_ref, bv1_ref, wv2t_ref, bv2_ref,
               o1_ref, o2_ref, a_ref):
    f32 = jnp.float32
    exact = (mm_dtype == jnp.float32)

    def cast(x):
        return x if x.dtype == mm_dtype else x.astype(mm_dtype)

    def mm(x_c, y_c):                       # 2-D matmul, f32 accumulation on the MXU
        return jnp.dot(x_c, y_c, preferred_element_type=f32)

    def heads(x):                           # (N, D) f32 -> (H, N, ds) in mm_dtype (lane slices)
        xc = cast(x)
        return jnp.stack([xc[:, h * ds:(h + 1) * ds] for h in range(num_heads)], axis=0)

    def cat_heads(x3):                      # (H, N, ds) f32 -> (N, D) (lane concat)
        return jnp.concatenate([x3[h] for h in range(num_heads)], axis=-1)

    # Weights loaded + cast once (reused across the batch-block loop and twice each).
    bq, bk = bq_ref[...], bk_ref[...]                       # (1, D) f32
    bv1, bv2 = bv1_ref[...], bv2_ref[...]
    wqt_c, wkt_c = cast(wqt_ref[...]), cast(wkt_ref[...])   # pre-transposed (D, D)
    wv1t_c, wv2t_c = cast(wv1t_ref[...]), cast(wv2t_ref[...])

    for b in range(batch_block):            # static, small; amortizes grid-step overhead
        q = q_ref[b]                        # (Nq, D) f32
        k = k_ref[b]                        # (Nk, D) f32

        # fc_q / fc_k : Linear -> ReLU  (Dropout == identity in eval mode)
        qt = jnp.maximum(mm(cast(q), wqt_c) + bq, 0.0)       # (Nq, D) f32
        kt = jnp.maximum(mm(cast(k), wkt_c) + bk, 0.0)       # (Nk, D) f32

        # fc_v1 / fc_v2 at full width (single D-wide matmuls; heads are lane slices).
        v1 = mm(cast(qt), wv1t_c) + bv1                      # (Nq, D) f32
        v2 = mm(cast(kt), wv2t_c) + bv2                      # (Nk, D) f32

        # Head-batched tensors (leading H). Scale folded into Q in f32 before the cast.
        qh = heads(qt * scale)                               # (H, Nq, ds)
        kh = heads(kt)                                       # (H, Nk, ds)
        v1h = heads(v1)                                      # (H, Nq, ds)
        v2h = heads(v2)                                      # (H, Nk, ds)

        # Batched attention scores + softmax (all f32 elementwise math).
        s = lax.dot_general(qh, kh, (((2,), (2,)), ((0,), (0,))),
                            preferred_element_type=f32)      # (H, Nq, Nk)
        s = s - jnp.max(s, axis=-1, keepdims=True)
        e = jnp.exp(s)
        a = e * pl.reciprocal(jnp.sum(e, axis=-1, keepdims=True), approx=not exact)

        a_ref[b] = a.astype(a_ref.dtype)                     # single lane-dense store

        a_mm = cast(a)
        # A · V2h  -> (H, Nq, ds)
        av2 = lax.dot_general(a_mm, v2h, (((2,), (1,)), ((0,), (0,))),
                              preferred_element_type=f32)
        # Aᵀ · V1h -> (H, Nk, ds)   (contract the Nq dim of A — no transpose materialized)
        atv1 = lax.dot_general(a_mm, v1h, (((1,), (1,)), ((0,), (0,))),
                               preferred_element_type=f32)

        # cat_h(V1h + A V2h) == V1 + cat_h(A V2h); then ONE (·,D)@(D,D) final Linear + ReLU.
        o1_cat = v1 + cat_heads(av2)                         # (Nq, D) f32
        o2_cat = v2 + cat_heads(atv1)                        # (Nk, D) f32

        o1_ref[b] = jnp.maximum(mm(cast(o1_cat), wqt_c) + bq, 0.0).astype(o1_ref.dtype)
        o2_ref[b] = jnp.maximum(mm(cast(o2_cat), wkt_c) + bk, 0.0).astype(o2_ref.dtype)


@functools.partial(jax.jit, static_argnames=("num_heads", "mm_dtype", "batch_block"))
def mab_forward(Q, K, params, num_heads, mm_dtype=jnp.bfloat16, batch_block=1):
    B, Nq, D = Q.shape
    _, Nk, Dk = K.shape
    assert D == Dk and D % num_heads == 0
    assert B % batch_block == 0
    H, ds, bb = num_heads, D // num_heads, batch_block
    wq, bq, wk, bk, wv1, bv1, wv2, bv2 = params

    # One-time weight layout prep on the XLA side: kernel computes x @ W^T directly.
    wqT, wkT, wv1T, wv2T = wq.T, wk.T, wv1.T, wv2.T

    def full_spec(shape):                                    # whole array, constant index
        n = len(shape)
        return pl.BlockSpec(shape, lambda i, _n=n: (0,) * _n)

    in_specs = [
        pl.BlockSpec((bb, Nq, D), lambda i: (i, 0, 0)),      # Q
        pl.BlockSpec((bb, Nk, D), lambda i: (i, 0, 0)),      # K
        full_spec((D, D)), full_spec((1, D)),                # Wq^T, bq
        full_spec((D, D)), full_spec((1, D)),                # Wk^T, bk
        full_spec((D, D)), full_spec((1, D)),                # Wv1^T, bv1
        full_spec((D, D)), full_spec((1, D)),                # Wv2^T, bv2
    ]
    out_specs = [
        pl.BlockSpec((bb, Nq, D), lambda i: (i, 0, 0)),          # O1
        pl.BlockSpec((bb, Nk, D), lambda i: (i, 0, 0)),          # O2
        pl.BlockSpec((bb, H, Nq, Nk), lambda i: (i, 0, 0, 0)),   # A (lane-dense, last dim Nk)
    ]

    kernel = functools.partial(mab_kernel, bb, H, ds, 1.0 / math.sqrt(ds), mm_dtype)

    o1, o2, a = pl.pallas_call(
        kernel,
        out_shape=(
            jax.ShapeDtypeStruct((B, Nq, D), jnp.float32),
            jax.ShapeDtypeStruct((B, Nk, D), jnp.float32),
            jax.ShapeDtypeStruct((B, H, Nq, Nk), jnp.float32),
        ),
        grid_spec=pltpu.PrefetchScalarGridSpec(
            num_scalar_prefetch=0,
            grid=(B // bb,),
            in_specs=in_specs,
            out_specs=out_specs,
        ),
        compiler_params=pltpu.CompilerParams(dimension_semantics=("parallel",)),
    )(Q, K, wqT, bq, wkT, bk, wv1T, bv1, wv2T, bv2)

    # (B, H, Nq, Nk) -> head-major (H*B, Nk, Nq); matches torch.cat(split, 0).transpose(1, 2).
    A_T = jnp.transpose(a, (1, 0, 3, 2)).reshape(H * B, Nk, Nq)
    return o1, o2, A_T


def mab_reference(Q, K, params, num_heads):
    """Pure-JAX re-implementation of the PyTorch forward (eval mode), for checking."""
    wq, bq, wk, bk, wv1, bv1, wv2, bv2 = params
    lin = lambda x, w, b: x @ w.T + b
    Qt = jax.nn.relu(lin(Q, wq, bq))
    Kt = jax.nn.relu(lin(K, wk, bk))
    V1 = lin(Qt, wv1, bv1)
    V2 = lin(Kt, wv2, bv2)
    D = Qt.shape[-1]
    ds = D // num_heads
    split_heads = lambda X: jnp.concatenate(jnp.split(X, num_heads, axis=2), axis=0)
    Q_, K_, V1_, V2_ = map(split_heads, (Qt, Kt, V1, V2))
    A = jax.nn.softmax(Q_ @ jnp.swapaxes(K_, 1, 2) / math.sqrt(ds), axis=2)
    A_T = jnp.swapaxes(A, 1, 2)
    O1 = jnp.concatenate(jnp.split(V1_ + A @ V2_, num_heads, axis=0), axis=2)
    O2 = jnp.concatenate(jnp.split(V2_ + A_T @ V1_, num_heads, axis=0), axis=2)
    O1 = jax.nn.relu(lin(O1, wq, bq))
    O2 = jax.nn.relu(lin(O2, wk, bk))
    return O1, O2, A_T


if __name__ == "__main__":
    # Small shapes consistent with the module: dim_Q = dim_K = dim_V = 32, 4 heads.
    B, Nq, Nk, D, H = 2, 8, 8, 32, 4

    key = jax.random.PRNGKey(0)
    ks = jax.random.split(key, 10)
    Q = jax.random.normal(ks[0], (B, Nq, D), jnp.float32)
    K = jax.random.normal(ks[1], (B, Nk, D), jnp.float32)

    def init_linear(kw, kb, fan_in, fan_out):
        bound = 1.0 / math.sqrt(fan_in)
        w = jax.random.uniform(kw, (fan_out, fan_in), jnp.float32, -bound, bound)
        b = jax.random.uniform(kb, (1, fan_out), jnp.float32, -bound, bound)
        return w, b

    wq, bq = init_linear(ks[2], ks[3], D, D)     # fc_q (Sequential Linear)
    wk, bk = init_linear(ks[4], ks[5], D, D)     # fc_k (Sequential Linear)
    wv1, bv1 = init_linear(ks[6], ks[7], D, D)   # fc_v1
    wv2, bv2 = init_linear(ks[8], ks[9], D, D)   # fc_v2
    params = (wq, bq, wk, bk, wv1, bv1, wv2, bv2)

    # TODO(synk): Dropout(p=0.25) is modeled as identity (eval mode); training-mode
    # stochastic masking is not reproduced.

    r1, r2, ra = mab_reference(Q, K, params, H)

    # Exact f32 path (also exercises batch blocking: one grid step covers both batches).
    o1, o2, a_t = jax.block_until_ready(
        mab_forward(Q, K, params, num_heads=H, mm_dtype=jnp.float32, batch_block=2))
    np.testing.assert_allclose(np.asarray(o1), np.asarray(r1), rtol=1e-5, atol=1e-5)
    np.testing.assert_allclose(np.asarray(o2), np.asarray(r2), rtol=1e-5, atol=1e-5)
    np.testing.assert_allclose(np.asarray(a_t), np.asarray(ra), rtol=1e-5, atol=1e-5)

    # Default fast path: bf16 MXU operands (f32 accumulation / f32 softmax), 2 parallel steps.
    o1b, o2b, atb = jax.block_until_ready(mab_forward(Q, K, params, num_heads=H))
    np.testing.assert_allclose(np.asarray(o1b), np.asarray(r1), rtol=5e-2, atol=5e-2)
    np.testing.assert_allclose(np.asarray(o2b), np.asarray(r2), rtol=5e-2, atol=5e-2)
    np.testing.assert_allclose(np.asarray(atb), np.asarray(ra), rtol=5e-2, atol=5e-2)

    print("KERNEL_OK")
</pallas_src>

<mosaic_0001>
module attributes {stable_mosaic.version = 11 : i64} {
  func.func @mab_kernel(%arg0: i32, %arg1: memref<2x8x32xf32, #tpu.memory_space<vmem>>, %arg2: memref<2x8x32xf32, #tpu.memory_space<vmem>>, %arg3: memref<32x32xf32, #tpu.memory_space<vmem>>, %arg4: memref<1x32xf32, #tpu.memory_space<vmem>>, %arg5: memref<32x32xf32, #tpu.memory_space<vmem>>, %arg6: memref<1x32xf32, #tpu.memory_space<vmem>>, %arg7: memref<32x32xf32, #tpu.memory_space<vmem>>, %arg8: memref<1x32xf32, #tpu.memory_space<vmem>>, %arg9: memref<32x32xf32, #tpu.memory_space<vmem>>, %arg10: memref<1x32xf32, #tpu.memory_space<vmem>>, %arg11: memref<2x8x32xf32, #tpu.memory_space<vmem>>, %arg12: memref<2x8x32xf32, #tpu.memory_space<vmem>>, %arg13: memref<2x4x8x8xf32, #tpu.memory_space<vmem>>) attributes {dimension_semantics = [#tpu.dimension_semantics<parallel>], iteration_bounds = array<i64: 1>, scalar_prefetch = 0 : i64, scratch_operands = 0 : i64, tpu.core_type = #tpu.core_type<tc>, window_params = [{transform_indices = @transform_0, window_bounds = array<i64: 2, 8, 32>}, {transform_indices = @transform_1, window_bounds = array<i64: 2, 8, 32>}, {pipeline_mode = #tpu.pipeline_mode<synchronous>, transform_indices = @transform_2, window_bounds = array<i64: 32, 32>}, {pipeline_mode = #tpu.pipeline_mode<synchronous>, transform_indices = @transform_3, window_bounds = array<i64: 1, 32>}, {pipeline_mode = #tpu.pipeline_mode<synchronous>, transform_indices = @transform_4, window_bounds = array<i64: 32, 32>}, {pipeline_mode = #tpu.pipeline_mode<synchronous>, transform_indices = @transform_5, window_bounds = array<i64: 1, 32>}, {pipeline_mode = #tpu.pipeline_mode<synchronous>, transform_indices = @transform_6, window_bounds = array<i64: 32, 32>}, {pipeline_mode = #tpu.pipeline_mode<synchronous>, transform_indices = @transform_7, window_bounds = array<i64: 1, 32>}, {pipeline_mode = #tpu.pipeline_mode<synchronous>, transform_indices = @transform_8, window_bounds = array<i64: 32, 32>}, {pipeline_mode = #tpu.pipeline_mode<synchronous>, transform_indices = @transform_9, window_bounds = array<i64: 1, 32>}, {transform_indices = @transform_10, window_bounds = array<i64: 2, 8, 32>}, {transform_indices = @transform_11, window_bounds = array<i64: 2, 8, 32>}, {transform_indices = @transform_12, window_bounds = array<i64: 2, 4, 8, 8>}]} {
    %c0 = arith.constant 0 : index
    %c0_0 = arith.constant 0 : index
    %0 = vector.load %arg4[%c0, %c0_0] : memref<1x32xf32, #tpu.memory_space<vmem>>, vector<1x32xf32>
    %c0_1 = arith.constant 0 : index
    %c0_2 = arith.constant 0 : index
    %1 = vector.load %arg6[%c0_1, %c0_2] : memref<1x32xf32, #tpu.memory_space<vmem>>, vector<1x32xf32>
    %c0_3 = arith.constant 0 : index
    %c0_4 = arith.constant 0 : index
    %2 = vector.load %arg8[%c0_3, %c0_4] : memref<1x32xf32, #tpu.memory_space<vmem>>, vector<1x32xf32>
    %c0_5 = arith.constant 0 : index
    %c0_6 = arith.constant 0 : index
    %3 = vector.load %arg10[%c0_5, %c0_6] : memref<1x32xf32, #tpu.memory_space<vmem>>, vector<1x32xf32>
    %c0_7 = arith.constant 0 : index
    %c0_8 = arith.constant 0 : index
    %4 = vector.load %arg3[%c0_7, %c0_8] : memref<32x32xf32, #tpu.memory_space<vmem>>, vector<32x32xf32>
    %c0_9 = arith.constant 0 : index
    %c0_10 = arith.constant 0 : index
    %5 = vector.load %arg5[%c0_9, %c0_10] : memref<32x32xf32, #tpu.memory_space<vmem>>, vector<32x32xf32>
    %c0_11 = arith.constant 0 : index
    %c0_12 = arith.constant 0 : index
    %6 = vector.load %arg7[%c0_11, %c0_12] : memref<32x32xf32, #tpu.memory_space<vmem>>, vector<32x32xf32>
    %c0_13 = arith.constant 0 : index
    %c0_14 = arith.constant 0 : index
    %7 = vector.load %arg9[%c0_13, %c0_14] : memref<32x32xf32, #tpu.memory_space<vmem>>, vector<32x32xf32>
    %c0_15 = arith.constant 0 : index
    %c0_16 = arith.constant 0 : index
    %c0_17 = arith.constant 0 : index
    %8 = vector.load %arg1[%c0_15, %c0_16, %c0_17] : memref<2x8x32xf32, #tpu.memory_space<vmem>>, vector<1x8x32xf32>
    %9 = vector.shape_cast %8 : vector<1x8x32xf32> to vector<8x32xf32>
    %c0_18 = arith.constant 0 : index
    %c0_19 = arith.constant 0 : index
    %c0_20 = arith.constant 0 : index
    %10 = vector.load %arg2[%c0_18, %c0_19, %c0_20] : memref<2x8x32xf32, #tpu.memory_space<vmem>>, vector<1x8x32xf32>
    %11 = vector.shape_cast %10 : vector<1x8x32xf32> to vector<8x32xf32>
    %cst = arith.constant dense<0.000000e+00> : vector<8x32xf32>
    %12 = tpu.matmul %9, %4, %cst {dimension_numbers = #tpu.dot_dimension_numbers<[1], [0], [0], [1], [0, 0, 1, 1], [], []>} : vector<8x32xf32>, vector<32x32xf32>, vector<8x32xf32> -> vector<8x32xf32>
    %13 = vector.broadcast %0 : vector<1x32xf32> to vector<8x32xf32>
    %14 = arith.addf %12, %13 : vector<8x32xf32>
    %cst_21 = arith.constant 0.000000e+00 : f32
    %15 = vector.broadcast %cst_21 : f32 to vector<8x32xf32>
    %16 = arith.maximumf %14, %15 : vector<8x32xf32>
    %cst_22 = arith.constant dense<0.000000e+00> : vector<8x32xf32>
    %17 = tpu.matmul %11, %5, %cst_22 {dimension_numbers = #tpu.dot_dimension_numbers<[1], [0], [0], [1], [0, 0, 1, 1], [], []>} : vector<8x32xf32>, vector<32x32xf32>, vector<8x32xf32> -> vector<8x32xf32>
    %18 = vector.broadcast %1 : vector<1x32xf32> to vector<8x32xf32>
    %19 = arith.addf %17, %18 : vector<8x32xf32>
    %cst_23 = arith.constant 0.000000e+00 : f32
    %20 = vector.broadcast %cst_23 : f32 to vector<8x32xf32>
    %21 = arith.maximumf %19, %20 : vector<8x32xf32>
    %cst_24 = arith.constant dense<0.000000e+00> : vector<8x32xf32>
    %22 = tpu.matmul %16, %6, %cst_24 {dimension_numbers = #tpu.dot_dimension_numbers<[1], [0], [0], [1], [0, 0, 1, 1], [], []>} : vector<8x32xf32>, vector<32x32xf32>, vector<8x32xf32> -> vector<8x32xf32>
    %23 = vector.broadcast %2 : vector<1x32xf32> to vector<8x32xf32>
    %24 = arith.addf %22, %23 : vector<8x32xf32>
    %cst_25 = arith.constant dense<0.000000e+00> : vector<8x32xf32>
    %25 = tpu.matmul %21, %7, %cst_25 {dimension_numbers = #tpu.dot_dimension_numbers<[1], [0], [0], [1], [0, 0, 1, 1], [], []>} : vector<8x32xf32>, vector<32x32xf32>, vector<8x32xf32> -> vector<8x32xf32>
    %26 = vector.broadcast %3 : vector<1x32xf32> to vector<8x32xf32>
    %27 = arith.addf %25, %26 : vector<8x32xf32>
    %cst_26 = arith.constant 0.353553385 : f32
    %28 = vector.broadcast %cst_26 : f32 to vector<8x32xf32>
    %29 = arith.mulf %16, %28 : vector<8x32xf32>
    %30 = vector.extract_strided_slice %29 {offsets = [0, 0], sizes = [8, 8], strides = [1, 1]} : vector<8x32xf32> to vector<8x8xf32>
    %31 = vector.extract_strided_slice %29 {offsets = [0, 8], sizes = [8, 8], strides = [1, 1]} : vector<8x32xf32> to vector<8x8xf32>
    %32 = vector.extract_strided_slice %29 {offsets = [0, 16], sizes = [8, 8], strides = [1, 1]} : vector<8x32xf32> to vector<8x8xf32>
    %33 = vector.extract_strided_slice %29 {offsets = [0, 24], sizes = [8, 8], strides = [1, 1]} : vector<8x32xf32> to vector<8x8xf32>
    %34 = vector.shape_cast %30 : vector<8x8xf32> to vector<1x8x8xf32>
    %35 = vector.shape_cast %31 : vector<8x8xf32> to vector<1x8x8xf32>
    %36 = vector.shape_cast %32 : vector<8x8xf32> to vector<1x8x8xf32>
    %37 = vector.shape_cast %33 : vector<8x8xf32> to vector<1x8x8xf32>
    %38 = tpu.concatenate %34, %35, %36, %37 in 0 : vector<1x8x8xf32>, vector<1x8x8xf32>, vector<1x8x8xf32>, vector<1x8x8xf32> -> vector<4x8x8xf32>
    %39 = vector.extract_strided_slice %21 {offsets = [0, 0], sizes = [8, 8], strides = [1, 1]} : vector<8x32xf32> to vector<8x8xf32>
    %40 = vector.extract_strided_slice %21 {offsets = [0, 8], sizes = [8, 8], strides = [1, 1]} : vector<8x32xf32> to vector<8x8xf32>
    %41 = vector.extract_strided_slice %21 {offsets = [0, 16], sizes = [8, 8], strides = [1, 1]} : vector<8x32xf32> to vector<8x8xf32>
    %42 = vector.extract_strided_slice %21 {offsets = [0, 24], sizes = [8, 8], strides = [1, 1]} : vector<8x32xf32> to vector<8x8xf32>
    %43 = vector.shape_cast %39 : vector<8x8xf32> to vector<1x8x8xf32>
    %44 = vector.shape_cast %40 : vector<8x8xf32> to vector<1x8x8xf32>
    %45 = vector.shape_cast %41 : vector<8x8xf32> to vector<1x8x8xf32>
    %46 = vector.shape_cast %42 : vector<8x8xf32> to vector<1x8x8xf32>
    %47 = tpu.concatenate %43, %44, %45, %46 in 0 : vector<1x8x8xf32>, vector<1x8x8xf32>, vector<1x8x8xf32>, vector<1x8x8xf32> -> vector<4x8x8xf32>
    %48 = vector.extract_strided_slice %24 {offsets = [0, 0], sizes = [8, 8], strides = [1, 1]} : vector<8x32xf32> to vector<8x8xf32>
    %49 = vector.extract_strided_slice %24 {offsets = [0, 8], sizes = [8, 8], strides = [1, 1]} : vector<8x32xf32> to vector<8x8xf32>
    %50 = vector.extract_strided_slice %24 {offsets = [0, 16], sizes = [8, 8], strides = [1, 1]} : vector<8x32xf32> to vector<8x8xf32>
    %51 = vector.extract_strided_slice %24 {offsets = [0, 24], sizes = [8, 8], strides = [1, 1]} : vector<8x32xf32> to vector<8x8xf32>
    %52 = vector.shape_cast %48 : vector<8x8xf32> to vector<1x8x8xf32>
    %53 = vector.shape_cast %49 : vector<8x8xf32> to vector<1x8x8xf32>
    %54 = vector.shape_cast %50 : vector<8x8xf32> to vector<1x8x8xf32>
    %55 = vector.shape_cast %51 : vector<8x8xf32> to vector<1x8x8xf32>
    %56 = tpu.concatenate %52, %53, %54, %55 in 0 : vector<1x8x8xf32>, vector<1x8x8xf32>, vector<1x8x8xf32>, vector<1x8x8xf32> -> vector<4x8x8xf32>
    %57 = vector.extract_strided_slice %27 {offsets = [0, 0], sizes = [8, 8], strides = [1, 1]} : vector<8x32xf32> to vector<8x8xf32>
    %58 = vector.extract_strided_slice %27 {offsets = [0, 8], sizes = [8, 8], strides = [1, 1]} : vector<8x32xf32> to vector<8x8xf32>
    %59 = vector.extract_strided_slice %27 {offsets = [0, 16], sizes = [8, 8], strides = [1, 1]} : vector<8x32xf32> to vector<8x8xf32>
    %60 = vector.extract_strided_slice %27 {offsets = [0, 24], sizes = [8, 8], strides = [1, 1]} : vector<8x32xf32> to vector<8x8xf32>
    %61 = vector.shape_cast %57 : vector<8x8xf32> to vector<1x8x8xf32>
    %62 = vector.shape_cast %58 : vector<8x8xf32> to vector<1x8x8xf32>
    %63 = vector.shape_cast %59 : vector<8x8xf32> to vector<1x8x8xf32>
    %64 = vector.shape_cast %60 : vector<8x8xf32> to vector<1x8x8xf32>
    %65 = tpu.concatenate %61, %62, %63, %64 in 0 : vector<1x8x8xf32>, vector<1x8x8xf32>, vector<1x8x8xf32>, vector<1x8x8xf32> -> vector<4x8x8xf32>
    %cst_27 = arith.constant dense<0.000000e+00> : vector<4x8x8xf32>
    %66 = tpu.matmul %38, %47, %cst_27 {dimension_numbers = #tpu.dot_dimension_numbers<[2], [2], [1], [1], [0, 0, 0, 1, 1, 1], [0], [0]>} : vector<4x8x8xf32>, vector<4x8x8xf32>, vector<4x8x8xf32> -> vector<4x8x8xf32>
    %cst_28 = arith.constant dense<0xFF800000> : vector<4x8xf32>
    %67 = vector.multi_reduction <maximumf>, %66, %cst_28 [2] : vector<4x8x8xf32> to vector<4x8xf32>
    %68 = vector.shape_cast %67 : vector<4x8xf32> to vector<4x8x1xf32>
    %69 = vector.broadcast %68 : vector<4x8x1xf32> to vector<4x8x8xf32>
    %70 = arith.subf %66, %69 : vector<4x8x8xf32>
    %71 = math.exp %70 : vector<4x8x8xf32>
    %cst_29 = arith.constant dense<0.000000e+00> : vector<4x8xf32>
    %72 = vector.multi_reduction <add>, %71, %cst_29 [2] : vector<4x8x8xf32> to vector<4x8xf32>
    %73 = vector.shape_cast %72 : vector<4x8xf32> to vector<4x8x1xf32>
    %74 = tpu.reciprocal %73 : vector<4x8x1xf32> -> vector<4x8x1xf32>
    %75 = vector.broadcast %74 : vector<4x8x1xf32> to vector<4x8x8xf32>
    %76 = arith.mulf %71, %75 : vector<4x8x8xf32>
    %c0_30 = arith.constant 0 : index
    %c0_31 = arith.constant 0 : index
    %c0_32 = arith.constant 0 : index
    %c0_33 = arith.constant 0 : index
    %77 = vector.load %arg13[%c0_30, %c0_31, %c0_32, %c0_33] : memref<2x4x8x8xf32, #tpu.memory_space<vmem>>, vector<1x4x8x8xf32>
    %78 = vector.shape_cast %77 : vector<1x4x8x8xf32> to vector<4x8x8xf32>
    %79 = vector.shape_cast %76 : vector<4x8x8xf32> to vector<1x4x8x8xf32>
    tpu.vector_store %arg13[%c0_30, %c0_31, %c0_32, %c0_33], %79 {strides = array<i32>} : memref<2x4x8x8xf32, #tpu.memory_space<vmem>>, vector<1x4x8x8xf32>,
    %cst_34 = arith.constant dense<0.000000e+00> : vector<4x8x8xf32>
    %80 = tpu.matmul %76, %65, %cst_34 {dimension_numbers = #tpu.dot_dimension_numbers<[2], [1], [1], [2], [0, 0, 0, 1, 1, 2], [0], [0]>} : vector<4x8x8xf32>, vector<4x8x8xf32>, vector<4x8x8xf32> -> vector<4x8x8xf32>
    %cst_35 = arith.constant dense<0.000000e+00> : vector<4x8x8xf32>
    %81 = tpu.matmul %76, %56, %cst_35 {dimension_numbers = #tpu.dot_dimension_numbers<[1], [1], [2], [2], [0, 0, 0, 2, 1, 2], [0], [0]>} : vector<4x8x8xf32>, vector<4x8x8xf32>, vector<4x8x8xf32> -> vector<4x8x8xf32>
    %82 = vector.extract_strided_slice %80 {offsets = [0, 0, 0], sizes = [1, 8, 8], strides = [1, 1, 1]} : vector<4x8x8xf32> to vector<1x8x8xf32>
    %83 = vector.shape_cast %82 : vector<1x8x8xf32> to vector<8x8xf32>
    %84 = vector.extract_strided_slice %80 {offsets = [1, 0, 0], sizes = [1, 8, 8], strides = [1, 1, 1]} : vector<4x8x8xf32> to vector<1x8x8xf32>
    %85 = vector.shape_cast %84 : vector<1x8x8xf32> to vector<8x8xf32>
    %86 = vector.extract_strided_slice %80 {offsets = [2, 0, 0], sizes = [1, 8, 8], strides = [1, 1, 1]} : vector<4x8x8xf32> to vector<1x8x8xf32>
    %87 = vector.shape_cast %86 : vector<1x8x8xf32> to vector<8x8xf32>
    %88 = vector.extract_strided_slice %80 {offsets = [3, 0, 0], sizes = [1, 8, 8], strides = [1, 1, 1]} : vector<4x8x8xf32> to vector<1x8x8xf32>
    %89 = vector.shape_cast %88 : vector<1x8x8xf32> to vector<8x8xf32>
    %90 = tpu.concatenate %83, %85, %87, %89 in 1 : vector<8x8xf32>, vector<8x8xf32>, vector<8x8xf32>, vector<8x8xf32> -> vector<8x32xf32>
    %91 = arith.addf %24, %90 : vector<8x32xf32>
    %92 = vector.extract_strided_slice %81 {offsets = [0, 0, 0], sizes = [1, 8, 8], strides = [1, 1, 1]} : vector<4x8x8xf32> to vector<1x8x8xf32>
    %93 = vector.shape_cast %92 : vector<1x8x8xf32> to vector<8x8xf32>
    %94 = vector.extract_strided_slice %81 {offsets = [1, 0, 0], sizes = [1, 8, 8], strides = [1, 1, 1]} : vector<4x8x8xf32> to vector<1x8x8xf32>
    %95 = vector.shape_cast %94 : vector<1x8x8xf32> to vector<8x8xf32>
    %96 = vector.extract_strided_slice %81 {offsets = [2, 0, 0], sizes = [1, 8, 8], strides = [1, 1, 1]} : vector<4x8x8xf32> to vector<1x8x8xf32>
    %97 = vector.shape_cast %96 : vector<1x8x8xf32> to vector<8x8xf32>
    %98 = vector.extract_strided_slice %81 {offsets = [3, 0, 0], sizes = [1, 8, 8], strides = [1, 1, 1]} : vector<4x8x8xf32> to vector<1x8x8xf32>
    %99 = vector.shape_cast %98 : vector<1x8x8xf32> to vector<8x8xf32>
    %100 = tpu.concatenate %93, %95, %97, %99 in 1 : vector<8x8xf32>, vector<8x8xf32>, vector<8x8xf32>, vector<8x8xf32> -> vector<8x32xf32>
    %101 = arith.addf %27, %100 : vector<8x32xf32>
    %cst_36 = arith.constant dense<0.000000e+00> : vector<8x32xf32>
    %102 = tpu.matmul %91, %4, %cst_36 {dimension_numbers = #tpu.dot_dimension_numbers<[1], [0], [0], [1], [0, 0, 1, 1], [], []>} : vector<8x32xf32>, vector<32x32xf32>, vector<8x32xf32> -> vector<8x32xf32>
    %103 = vector.broadcast %0 : vector<1x32xf32> to vector<8x32xf32>
    %104 = arith.addf %102, %103 : vector<8x32xf32>
    %cst_37 = arith.constant 0.000000e+00 : f32
    %105 = vector.broadcast %cst_37 : f32 to vector<8x32xf32>
    %106 = arith.maximumf %104, %105 : vector<8x32xf32>
    %c0_38 = arith.constant 0 : index
    %c0_39 = arith.constant 0 : index
    %c0_40 = arith.constant 0 : index
    %107 = vector.load %arg11[%c0_38, %c0_39, %c0_40] : memref<2x8x32xf32, #tpu.memory_space<vmem>>, vector<1x8x32xf32>
    %108 = vector.shape_cast %107 : vector<1x8x32xf32> to vector<8x32xf32>
    %109 = vector.shape_cast %106 : vector<8x32xf32> to vector<1x8x32xf32>
    tpu.vector_store %arg11[%c0_38, %c0_39, %c0_40], %109 {strides = array<i32>} : memref<2x8x32xf32, #tpu.memory_space<vmem>>, vector<1x8x32xf32>,
    %cst_41 = arith.constant dense<0.000000e+00> : vector<8x32xf32>
    %110 = tpu.matmul %101, %5, %cst_41 {dimension_numbers = #tpu.dot_dimension_numbers<[1], [0], [0], [1], [0, 0, 1, 1], [], []>} : vector<8x32xf32>, vector<32x32xf32>, vector<8x32xf32> -> vector<8x32xf32>
    %111 = vector.broadcast %1 : vector<1x32xf32> to vector<8x32xf32>
    %112 = arith.addf %110, %111 : vector<8x32xf32>
    %cst_42 = arith.constant 0.000000e+00 : f32
    %113 = vector.broadcast %cst_42 : f32 to vector<8x32xf32>
    %114 = arith.maximumf %112, %113 : vector<8x32xf32>
    %c0_43 = arith.constant 0 : index
    %c0_44 = arith.constant 0 : index
    %c0_45 = arith.constant 0 : index
    %115 = vector.load %arg12[%c0_43, %c0_44, %c0_45] : memref<2x8x32xf32, #tpu.memory_space<vmem>>, vector<1x8x32xf32>
    %116 = vector.shape_cast %115 : vector<1x8x32xf32> to vector<8x32xf32>
    %117 = vector.shape_cast %114 : vector<8x32xf32> to vector<1x8x32xf32>
    tpu.vector_store %arg12[%c0_43, %c0_44, %c0_45], %117 {strides = array<i32>} : memref<2x8x32xf32, #tpu.memory_space<vmem>>, vector<1x8x32xf32>,
    %c1 = arith.constant 1 : index
    %c0_46 = arith.constant 0 : index
    %c0_47 = arith.constant 0 : index
    %118 = vector.load %arg1[%c1, %c0_46, %c0_47] : memref<2x8x32xf32, #tpu.memory_space<vmem>>, vector<1x8x32xf32>
    %119 = vector.shape_cast %118 : vector<1x8x32xf32> to vector<8x32xf32>
    %c1_48 = arith.constant 1 : index
    %c0_49 = arith.constant 0 : index
    %c0_50 = arith.constant 0 : index
    %120 = vector.load %arg2[%c1_48, %c0_49, %c0_50] : memref<2x8x32xf32, #tpu.memory_space<vmem>>, vector<1x8x32xf32>
    %121 = vector.shape_cast %120 : vector<1x8x32xf32> to vector<8x32xf32>
    %cst_51 = arith.constant dense<0.000000e+00> : vector<8x32xf32>
    %122 = tpu.matmul %119, %4, %cst_51 {dimension_numbers = #tpu.dot_dimension_numbers<[1], [0], [0], [1], [0, 0, 1, 1], [], []>} : vector<8x32xf32>, vector<32x32xf32>, vector<8x32xf32> -> vector<8x32xf32>
    %123 = vector.broadcast %0 : vector<1x32xf32> to vector<8x32xf32>
    %124 = arith.addf %122, %123 : vector<8x32xf32>
    %cst_52 = arith.constant 0.000000e+00 : f32
    %125 = vector.broadcast %cst_52 : f32 to vector<8x32xf32>
    %126 = arith.maximumf %124, %125 : vector<8x32xf32>
    %cst_53 = arith.constant dense<0.000000e+00> : vector<8x32xf32>
    %127 = tpu.matmul %121, %5, %cst_53 {dimension_numbers = #tpu.dot_dimension_numbers<[1], [0], [0], [1], [0, 0, 1, 1], [], []>} : vector<8x32xf32>, vector<32x32xf32>, vector<8x32xf32> -> vector<8x32xf32>
    %128 = vector.broadcast %1 : vector<1x32xf32> to vector<8x32xf32>
    %129 = arith.addf %127, %128 : vector<8x32xf32>
    %cst_54 = arith.constant 0.000000e+00 : f32
    %130 = vector.broadcast %cst_54 : f32 to vector<8x32xf32>
    %131 = arith.maximumf %129, %130 : vector<8x32xf32>
    %cst_55 = arith.constant dense<0.000000e+00> : vector<8x32xf32>
    %132 = tpu.matmul %126, %6, %cst_55 {dimension_numbers = #tpu.dot_dimension_numbers<[1], [0], [0], [1], [0, 0, 1, 1], [], []>} : vector<8x32xf32>, vector<32x32xf32>, vector<8x32xf32> -> vector<8x32xf32>
    %133 = vector.broadcast %2 : vector<1x32xf32> to vector<8x32xf32>
    %134 = arith.addf %132, %133 : vector<8x32xf32>
    %cst_56 = arith.constant dense<0.000000e+00> : vector<8x32xf32>
    %135 = tpu.matmul %131, %7, %cst_56 {dimension_numbers = #tpu.dot_dimension_numbers<[1], [0], [0], [1], [0, 0, 1, 1], [], []>} : vector<8x32xf32>, vector<32x32xf32>, vector<8x32xf32> -> vector<8x32xf32>
    %136 = vector.broadcast %3 : vector<1x32xf32> to vector<8x32xf32>
    %137 = arith.addf %135, %136 : vector<8x32xf32>
    %cst_57 = arith.constant 0.353553385 : f32
    %138 = vector.broadcast %cst_57 : f32 to vector<8x32xf32>
    %139 = arith.mulf %126, %138 : vector<8x32xf32>
    %140 = vector.extract_strided_slice %139 {offsets = [0, 0], sizes = [8, 8], strides = [1, 1]} : vector<8x32xf32> to vector<8x8xf32>
    %141 = vector.extract_strided_slice %139 {offsets = [0, 8], sizes = [8, 8], strides = [1, 1]} : vector<8x32xf32> to vector<8x8xf32>
    %142 = vector.extract_strided_slice %139 {offsets = [0, 16], sizes = [8, 8], strides = [1, 1]} : vector<8x32xf32> to vector<8x8xf32>
    %143 = vector.extract_strided_slice %139 {offsets = [0, 24], sizes = [8, 8], strides = [1, 1]} : vector<8x32xf32> to vector<8x8xf32>
    %144 = vector.shape_cast %140 : vector<8x8xf32> to vector<1x8x8xf32>
    %145 = vector.shape_cast %141 : vector<8x8xf32> to vector<1x8x8xf32>
    %146 = vector.shape_cast %142 : vector<8x8xf32> to vector<1x8x8xf32>
    %147 = vector.shape_cast %143 : vector<8x8xf32> to vector<1x8x8xf32>
    %148 = tpu.concatenate %144, %145, %146, %147 in 0 : vector<1x8x8xf32>, vector<1x8x8xf32>, vector<1x8x8xf32>, vector<1x8x8xf32> -> vector<4x8x8xf32>
    %149 = vector.extract_strided_slice %131 {offsets = [0, 0], sizes = [8, 8], strides = [1, 1]} : vector<8x32xf32> to vector<8x8xf32>
    %150 = vector.extract_strided_slice %131 {offsets = [0, 8], sizes = [8, 8], strides = [1, 1]} : vector<8x32xf32> to vector<8x8xf32>
    %151 = vector.extract_strided_slice %131 {offsets = [0, 16], sizes = [8, 8], strides = [1, 1]} : vector<8x32xf32> to vector<8x8xf32>
    %152 = vector.extract_strided_slice %131 {offsets = [0, 24], sizes = [8, 8], strides = [1, 1]} : vector<8x32xf32> to vector<8x8xf32>
    %153 = vector.shape_cast %149 : vector<8x8xf32> to vector<1x8x8xf32>
    %154 = vector.shape_cast %150 : vector<8x8xf32> to vector<1x8x8xf32>
    %155 = vector.shape_cast %151 : vector<8x8xf32> to vector<1x8x8xf32>
    %156 = vector.shape_cast %152 : vector<8x8xf32> to vector<1x8x8xf32>
    %157 = tpu.concatenate %153, %154, %155, %156 in 0 : vector<1x8x8xf32>, vector<1x8x8xf32>, vector<1x8x8xf32>, vector<1x8x8xf32> -> vector<4x8x8xf32>
    %158 = vector.extract_strided_slice %134 {offsets = [0, 0], sizes = [8, 8], strides = [1, 1]} : vector<8x32xf32> to vector<8x8xf32>
    %159 = vector.extract_strided_slice %134 {offsets = [0, 8], sizes = [8, 8], strides = [1, 1]} : vector<8x32xf32> to vector<8x8xf32>
    %160 = vector.extract_strided_slice %134 {offsets = [0, 16], sizes = [8, 8], strides = [1, 1]} : vector<8x32xf32> to vector<8x8xf32>
    %161 = vector.extract_strided_slice %134 {offsets = [0, 24], sizes = [8, 8], strides = [1, 1]} : vector<8x32xf32> to vector<8x8xf32>
    %162 = vector.shape_cast %158 : vector<8x8xf32> to vector<1x8x8xf32>
    %163 = vector.shape_cast %159 : vector<8x8xf32> to vector<1x8x8xf32>
    %164 = vector.shape_cast %160 : vector<8x8xf32> to vector<1x8x8xf32>
    %165 = vector.shape_cast %161 : vector<8x8xf32> to vector<1x8x8xf32>
    %166 = tpu.concatenate %162, %163, %164, %165 in 0 : vector<1x8x8xf32>, vector<1x8x8xf32>, vector<1x8x8xf32>, vector<1x8x8xf32> -> vector<4x8x8xf32>
    %167 = vector.extract_strided_slice %137 {offsets = [0, 0], sizes = [8, 8], strides = [1, 1]} : vector<8x32xf32> to vector<8x8xf32>
    %168 = vector.extract_strided_slice %137 {offsets = [0, 8], sizes = [8, 8], strides = [1, 1]} : vector<8x32xf32> to vector<8x8xf32>
    %169 = vector.extract_strided_slice %137 {offsets = [0, 16], sizes = [8, 8], strides = [1, 1]} : vector<8x32xf32> to vector<8x8xf32>
    %170 = vector.extract_strided_slice %137 {offsets = [0, 24], sizes = [8, 8], strides = [1, 1]} : vector<8x32xf32> to vector<8x8xf32>
    %171 = vector.shape_cast %167 : vector<8x8xf32> to vector<1x8x8xf32>
    %172 = vector.shape_cast %168 : vector<8x8xf32> to vector<1x8x8xf32>
    %173 = vector.shape_cast %169 : vector<8x8xf32> to vector<1x8x8xf32>
    %174 = vector.shape_cast %170 : vector<8x8xf32> to vector<1x8x8xf32>
    %175 = tpu.concatenate %171, %172, %173, %174 in 0 : vector<1x8x8xf32>, vector<1x8x8xf32>, vector<1x8x8xf32>, vector<1x8x8xf32> -> vector<4x8x8xf32>
    %cst_58 = arith.constant dense<0.000000e+00> : vector<4x8x8xf32>
    %176 = tpu.matmul %148, %157, %cst_58 {dimension_numbers = #tpu.dot_dimension_numbers<[2], [2], [1], [1], [0, 0, 0, 1, 1, 1], [0], [0]>} : vector<4x8x8xf32>, vector<4x8x8xf32>, vector<4x8x8xf32> -> vector<4x8x8xf32>
    %cst_59 = arith.constant dense<0xFF800000> : vector<4x8xf32>
    %177 = vector.multi_reduction <maximumf>, %176, %cst_59 [2] : vector<4x8x8xf32> to vector<4x8xf32>
    %178 = vector.shape_cast %177 : vector<4x8xf32> to vector<4x8x1xf32>
    %179 = vector.broadcast %178 : vector<4x8x1xf32> to vector<4x8x8xf32>
    %180 = arith.subf %176, %179 : vector<4x8x8xf32>
    %181 = math.exp %180 : vector<4x8x8xf32>
    %cst_60 = arith.constant dense<0.000000e+00> : vector<4x8xf32>
    %182 = vector.multi_reduction <add>, %181, %cst_60 [2] : vector<4x8x8xf32> to vector<4x8xf32>
    %183 = vector.shape_cast %182 : vector<4x8xf32> to vector<4x8x1xf32>
    %184 = tpu.reciprocal %183 : vector<4x8x1xf32> -> vector<4x8x1xf32>
    %185 = vector.broadcast %184 : vector<4x8x1xf32> to vector<4x8x8xf32>
    %186 = arith.mulf %181, %185 : vector<4x8x8xf32>
    %c1_61 = arith.constant 1 : index
    %c0_62 = arith.constant 0 : index
    %c0_63 = arith.constant 0 : index
    %c0_64 = arith.constant 0 : index
    %187 = vector.load %arg13[%c1_61, %c0_62, %c0_63, %c0_64] : memref<2x4x8x8xf32, #tpu.memory_space<vmem>>, vector<1x4x8x8xf32>
    %188 = vector.shape_cast %187 : vector<1x4x8x8xf32> to vector<4x8x8xf32>
    %189 = vector.shape_cast %186 : vector<4x8x8xf32> to vector<1x4x8x8xf32>
    tpu.vector_store %arg13[%c1_61, %c0_62, %c0_63, %c0_64], %189 {strides = array<i32>} : memref<2x4x8x8xf32, #tpu.memory_space<vmem>>, vector<1x4x8x8xf32>,
    %cst_65 = arith.constant dense<0.000000e+00> : vector<4x8x8xf32>
    %190 = tpu.matmul %186, %175, %cst_65 {dimension_numbers = #tpu.dot_dimension_numbers<[2], [1], [1], [2], [0, 0, 0, 1, 1, 2], [0], [0]>} : vector<4x8x8xf32>, vector<4x8x8xf32>, vector<4x8x8xf32> -> vector<4x8x8xf32>
    %cst_66 = arith.constant dense<0.000000e+00> : vector<4x8x8xf32>
    %191 = tpu.matmul %186, %166, %cst_66 {dimension_numbers = #tpu.dot_dimension_numbers<[1], [1], [2], [2], [0, 0, 0, 2, 1, 2], [0], [0]>} : vector<4x8x8xf32>, vector<4x8x8xf32>, vector<4x8x8xf32> -> vector<4x8x8xf32>
    %192 = vector.extract_strided_slice %190 {offsets = [0, 0, 0], sizes = [1, 8, 8], strides = [1, 1, 1]} : vector<4x8x8xf32> to vector<1x8x8xf32>
    %193 = vector.shape_cast %192 : vector<1x8x8xf32> to vector<8x8xf32>
    %194 = vector.extract_strided_slice %190 {offsets = [1, 0, 0], sizes = [1, 8, 8], strides = [1, 1, 1]} : vector<4x8x8xf32> to vector<1x8x8xf32>
    %195 = vector.shape_cast %194 : vector<1x8x8xf32> to vector<8x8xf32>
    %196 = vector.extract_strided_slice %190 {offsets = [2, 0, 0], sizes = [1, 8, 8], strides = [1, 1, 1]} : vector<4x8x8xf32> to vector<1x8x8xf32>
    %197 = vector.shape_cast %196 : vector<1x8x8xf32> to vector<8x8xf32>
    %198 = vector.extract_strided_slice %190 {offsets = [3, 0, 0], sizes = [1, 8, 8], strides = [1, 1, 1]} : vector<4x8x8xf32> to vector<1x8x8xf32>
    %199 = vector.shape_cast %198 : vector<1x8x8xf32> to vector<8x8xf32>
    %200 = tpu.concatenate %193, %195, %197, %199 in 1 : vector<8x8xf32>, vector<8x8xf32>, vector<8x8xf32>, vector<8x8xf32> -> vector<8x32xf32>
    %201 = arith.addf %134, %200 : vector<8x32xf32>
    %202 = vector.extract_strided_slice %191 {offsets = [0, 0, 0], sizes = [1, 8, 8], strides = [1, 1, 1]} : vector<4x8x8xf32> to vector<1x8x8xf32>
    %203 = vector.shape_cast %202 : vector<1x8x8xf32> to vector<8x8xf32>
    %204 = vector.extract_strided_slice %191 {offsets = [1, 0, 0], sizes = [1, 8, 8], strides = [1, 1, 1]} : vector<4x8x8xf32> to vector<1x8x8xf32>
    %205 = vector.shape_cast %204 : vector<1x8x8xf32> to vector<8x8xf32>
    %206 = vector.extract_strided_slice %191 {offsets = [2, 0, 0], sizes = [1, 8, 8], strides = [1, 1, 1]} : vector<4x8x8xf32> to vector<1x8x8xf32>
    %207 = vector.shape_cast %206 : vector<1x8x8xf32> to vector<8x8xf32>
    %208 = vector.extract_strided_slice %191 {offsets = [3, 0, 0], sizes = [1, 8, 8], strides = [1, 1, 1]} : vector<4x8x8xf32> to vector<1x8x8xf32>
    %209 = vector.shape_cast %208 : vector<1x8x8xf32> to vector<8x8xf32>
    %210 = tpu.concatenate %203, %205, %207, %209 in 1 : vector<8x8xf32>, vector<8x8xf32>, vector<8x8xf32>, vector<8x8xf32> -> vector<8x32xf32>
    %211 = arith.addf %137, %210 : vector<8x32xf32>
    %cst_67 = arith.constant dense<0.000000e+00> : vector<8x32xf32>
    %212 = tpu.matmul %201, %4, %cst_67 {dimension_numbers = #tpu.dot_dimension_numbers<[1], [0], [0], [1], [0, 0, 1, 1], [], []>} : vector<8x32xf32>, vector<32x32xf32>, vector<8x32xf32> -> vector<8x32xf32>
    %213 = vector.broadcast %0 : vector<1x32xf32> to vector<8x32xf32>
    %214 = arith.addf %212, %213 : vector<8x32xf32>
    %cst_68 = arith.constant 0.000000e+00 : f32
    %215 = vector.broadcast %cst_68 : f32 to vector<8x32xf32>
    %216 = arith.maximumf %214, %215 : vector<8x32xf32>
    %c1_69 = arith.constant 1 : index
    %c0_70 = arith.constant 0 : index
    %c0_71 = arith.constant 0 : index
    %217 = vector.load %arg11[%c1_69, %c0_70, %c0_71] : memref<2x8x32xf32, #tpu.memory_space<vmem>>, vector<1x8x32xf32>
    %218 = vector.shape_cast %217 : vector<1x8x32xf32> to vector<8x32xf32>
    %219 = vector.shape_cast %216 : vector<8x32xf32> to vector<1x8x32xf32>
    tpu.vector_store %arg11[%c1_69, %c0_70, %c0_71], %219 {strides = array<i32>} : memref<2x8x32xf32, #tpu.memory_space<vmem>>, vector<1x8x32xf32>,
    %cst_72 = arith.constant dense<0.000000e+00> : vector<8x32xf32>
    %220 = tpu.matmul %211, %5, %cst_72 {dimension_numbers = #tpu.dot_dimension_numbers<[1], [0], [0], [1], [0, 0, 1, 1], [], []>} : vector<8x32xf32>, vector<32x32xf32>, vector<8x32xf32> -> vector<8x32xf32>
    %221 = vector.broadcast %1 : vector<1x32xf32> to vector<8x32xf32>
    %222 = arith.addf %220, %221 : vector<8x32xf32>
    %cst_73 = arith.constant 0.000000e+00 : f32
    %223 = vector.broadcast %cst_73 : f32 to vector<8x32xf32>
    %224 = arith.maximumf %222, %223 : vector<8x32xf32>
    %c1_74 = arith.constant 1 : index
    %c0_75 = arith.constant 0 : index
    %c0_76 = arith.constant 0 : index
    %225 = vector.load %arg12[%c1_74, %c0_75, %c0_76] : memref<2x8x32xf32, #tpu.memory_space<vmem>>, vector<1x8x32xf32>
    %226 = vector.shape_cast %225 : vector<1x8x32xf32> to vector<8x32xf32>
    %227 = vector.shape_cast %224 : vector<8x32xf32> to vector<1x8x32xf32>
    tpu.vector_store %arg12[%c1_74, %c0_75, %c0_76], %227 {strides = array<i32>} : memref<2x8x32xf32, #tpu.memory_space<vmem>>, vector<1x8x32xf32>,
    return
  }
  func.func @transform_0(%arg0: i32) -> (i32, i32, i32) {
    %c0_i32 = arith.constant 0 : i32
    %c0_i32_0 = arith.constant 0 : i32
    %c0_i32_1 = arith.constant 0 : i32
    return %arg0, %c0_i32, %c0_i32_0 : i32, i32, i32
  }
  func.func @transform_1(%arg0: i32) -> (i32, i32, i32) {
    %c0_i32 = arith.constant 0 : i32
    %c0_i32_0 = arith.constant 0 : i32
    %c0_i32_1 = arith.constant 0 : i32
    return %arg0, %c0_i32, %c0_i32_0 : i32, i32, i32
  }
  func.func @transform_2(%arg0: i32) -> (i32, i32) {
    %c0_i32 = arith.constant 0 : i32
    %c0_i32_0 = arith.constant 0 : i32
    %c0_i32_1 = arith.constant 0 : i32
    return %c0_i32, %c0_i32_0 : i32, i32
  }
  func.func @transform_3(%arg0: i32) -> (i32, i32) {
    %c0_i32 = arith.constant 0 : i32
    %c0_i32_0 = arith.constant 0 : i32
    %c0_i32_1 = arith.constant 0 : i32
    return %c0_i32, %c0_i32_0 : i32, i32
  }
  func.func @transform_4(%arg0: i32) -> (i32, i32) {
    %c0_i32 = arith.constant 0 : i32
    %c0_i32_0 = arith.constant 0 : i32
    %c0_i32_1 = arith.constant 0 : i32
    return %c0_i32, %c0_i32_0 : i32, i32
  }
  func.func @transform_5(%arg0: i32) -> (i32, i32) {
    %c0_i32 = arith.constant 0 : i32
    %c0_i32_0 = arith.constant 0 : i32
    %c0_i32_1 = arith.constant 0 : i32
    return %c0_i32, %c0_i32_0 : i32, i32
  }
  func.func @transform_6(%arg0: i32) -> (i32, i32) {
    %c0_i32 = arith.constant 0 : i32
    %c0_i32_0 = arith.constant 0 : i32
    %c0_i32_1 = arith.constant 0 : i32
    return %c0_i32, %c0_i32_0 : i32, i32
  }
  func.func @transform_7(%arg0: i32) -> (i32, i32) {
    %c0_i32 = arith.constant 0 : i32
    %c0_i32_0 = arith.constant 0 : i32
    %c0_i32_1 = arith.constant 0 : i32
    return %c0_i32, %c0_i32_0 : i32, i32
  }
  func.func @transform_8(%arg0: i32) -> (i32, i32) {
    %c0_i32 = arith.constant 0 : i32
    %c0_i32_0 = arith.constant 0 : i32
    %c0_i32_1 = arith.constant 0 : i32
    return %c0_i32, %c0_i32_0 : i32, i32
  }
  func.func @transform_9(%arg0: i32) -> (i32, i32) {
    %c0_i32 = arith.constant 0 : i32
    %c0_i32_0 = arith.constant 0 : i32
    %c0_i32_1 = arith.constant 0 : i32
    return %c0_i32, %c0_i32_0 : i32, i32
  }
  func.func @transform_10(%arg0: i32) -> (i32, i32, i32) {
    %c0_i32 = arith.constant 0 : i32
    %c0_i32_0 = arith.constant 0 : i32
    %c0_i32_1 = arith.constant 0 : i32
    return %arg0, %c0_i32, %c0_i32_0 : i32, i32, i32
  }
  func.func @transform_11(%arg0: i32) -> (i32, i32, i32) {
    %c0_i32 = arith.constant 0 : i32
    %c0_i32_0 = arith.constant 0 : i32
    %c0_i32_1 = arith.constant 0 : i32
    return %arg0, %c0_i32, %c0_i32_0 : i32, i32, i32
  }
  func.func @transform_12(%arg0: i32) -> (i32, i32, i32, i32) {
    %c0_i32 = arith.constant 0 : i32
    %c0_i32_0 = arith.constant 0 : i32
    %c0_i32_1 = arith.constant 0 : i32
    %c0_i32_2 = arith.constant 0 : i32
    return %arg0, %c0_i32, %c0_i32_0, %c0_i32_1 : i32, i32, i32, i32
  }
}

</mosaic_0001>

<bundles_post_ra>
// kernel: mab_forward.1
= control target key start
LH: loop header
LB: loop body
LE: loop exit
PB: predicated region body
PF: predicated region fallthrough
CT: control target
= control target key end

     0   :  { %18 = vsyncpa [#allocation3], 0  ;;  %vm65_vm0 = vcmask 261120   ;;  %s2173_s0 = inlined_call_operand.vmem [shape: f32[2,8,32], index: 0, kind: input, shape index: {}]   ;;  %s2174_s1 = inlined_call_operand.vmem [shape: f32[2,8,32], index: 1, kind: input, shape index: {}]   ;;  %s2175_s2 = inlined_call_operand.vmem [shape: f32[32,32], index: 2, kind: input, shape index: {}]   ;;  %s2176_s3 = inlined_call_operand.vmem [shape: f32[1,32], index: 3, kind: input, shape index: {}]   ;;  %s2177_s4 = inlined_call_operand.vmem [shape: f32[32,32], index: 4, kind: input, shape index: {}]   ;;  %s2178_s5 = inlined_call_operand.vmem [shape: f32[1,32], index: 5, kind: input, shape index: {}]   ;;  %s2179_s6 = inlined_call_operand.vmem [shape: f32[32,32], index: 6, kind: input, shape index: {}]   ;;  %s2180_s7 = inlined_call_operand.vmem [shape: f32[1,32], index: 7, kind: input, shape index: {}]   ;;  %s2181_s8 = inlined_call_operand.vmem [shape: f32[32,32], index: 8, kind: input, shape index: {}]   ;;  %s2182_s9 = inlined_call_operand.vmem [shape: f32[1,32], index: 9, kind: input, shape index: {}]   ;;  %s2183_s10 = inlined_call_operand.hbm [shape: f32[2,8,32], index: 10, kind: output, shape index: {0}]   ;;  %s2184_s11 = inlined_call_operand.hbm [shape: f32[2,8,32], index: 11, kind: output, shape index: {1}]   ;;  %s2185_s12 = inlined_call_operand.vmem [shape: f32[2,4,8,8], index: 12, kind: output, shape index: {2}]  }
   0x1   :  { %v1811_v0 = vld [vmem:[%s2175_s2 + $0x18] sm:$0xff]  ;;  %v1821_v2 = vld [vmem:[%s2175_s2 + $0x10] sm:$0xff]  ;;  %v1833_v4 = vld [vmem:[%s2175_s2 + $0x8] sm:$0xff] }
   0x2   :  { %v1816_v1 = vld [vmem:[%s2177_s4 + $0x18] sm:$0xff]  ;;  %81 = vmatpush.msra.mxu0 %v1811_v0  ;;  %v1828_v3 = vld [vmem:[%s2177_s4 + $0x10] sm:$0xff]  ;;  %v1838_v5 = vld [vmem:[%s2177_s4 + $0x8] sm:$0xff] }
   0x3   :  { %108 = vmatpush.msra.mxu1 %v1816_v1  ;;  %v1843_v6 = vld [vmem:[%s2175_s2] sm:$0xff]  ;;  %v1858_v9 = vld [vmem:[%s2179_s6 + $0x18] sm:$0xff] }
   0x4   :  { %v1848_v7 = vld [vmem:[%s2177_s4] sm:$0xff]  ;;  %82 = vmatpush.msra.mxu0 %v1821_v2  ;;  %v1863_v10 = vld [vmem:[%s2181_s8 + $0x18] sm:$0xff]  ;;  %135 = vmatpush.msra.mxu2 %v1858_v9 }
   0x5   :  { %109 = vmatpush.msra.mxu1 %v1828_v3  ;;  %v60_v8 = vld [vmem:[%s2173_s0] sm:$0xff]  ;;  %161 = vmatpush.msra.mxu3 %v1863_v10 }
   0x6   :  { %v61_v11 = vld [vmem:[%s2174_s1] sm:$0xff]  ;;  %83 = vmatpush.msra.mxu0 %v1833_v4 }
   0x7   :  { %110 = vmatpush.msra.mxu1 %v1838_v5 }
   0x8   :  { %19 = vsyncpa [#allocation5], 0  ;;  %84 = vmatpush.msra.mxu0 %v1843_v6  ;;  %v1879_v12 = vld [vmem:[%s2179_s6 + $0x10] sm:$0xff]  ;;  %v1891_v14 = vld [vmem:[%s2179_s6 + $0x8] sm:$0xff]  ;;  %vm203_vm1 = vcmask 64512   ;;  %s1737_s30 = smov 8  }
   0x9   :  { %111 = vmatpush.msra.mxu1 %v1848_v7  ;;  %1561 = vmatmul.msk.f32.vlgmr.msra.gmra.mxu0 %vm65_vm0, %v60_v8  ;;  %v1884_v13 = vld [vmem:[%s2181_s8 + $0x10] sm:$0xff]  ;;  %v1896_v15 = vld [vmem:[%s2181_s8 + $0x8] sm:$0xff]  ;;  %v1903_v16 = vld [vmem:[%s2179_s6] sm:$0xff]  ;;  %s1734_s6 = smov 120   ;;  %s1738_s13 = smov 16  }
   0xa   :  { %1562 = vmatmul.msk.f32.vlgmr.msra.gmra.mxu1 %vm65_vm0, %v61_v11  ;;  %136 = vmatpush.msra.mxu2 %v1879_v12  ;;  %v1908_v17 = vld [vmem:[%s2181_s8] sm:$0xff]  ;;  %s1739_s14 = smov 24   ;;  %s1540_s23 = sshll.u32 %s2184_s11, 4  ;;  %s1541_s23 = int_to_ptr.hbm [resolvable:$true] %s1540_s23 }
   0xb   :  { %162 = vmatpush.msra.mxu3 %v1884_v13  ;;  %v1915_v18 = vld [vmem:[%s2176_s3] ss:$0 sm:$0xff]  ;;  %s1735_s3 = smov 104   ;;  %s1741_s4 = smov [#allocation2]  }
   0xc   :  { %137 = vmatpush.msra.mxu2 %v1891_v14  ;;  %v1920_v19 = vld [vmem:[%s2178_s5] ss:$0 sm:$0xff]  ;;  %s1736_s5 = smov 112   ;;  %s1527_s25 = sshll.u32 %s2183_s10, 4  ;;  %s1528_s25 = int_to_ptr.hbm [resolvable:$true] %s1527_s25 }
   0xd   :  { %163 = vmatpush.msra.mxu3 %v1896_v15  ;;  %v1943_v33 = vld [vmem:[%s2180_s7] ss:$0 sm:$0xff]  ;;  %s1525_s7 = sshll.u32 %s1741_s4, 4  ;;  %s1742_s26 = smov 128   ;;  %s1526_s7 = int_to_ptr.vmem [resolvable:$true] %s1525_s7 }
   0xe   :  { %138 = vmatpush.msra.mxu2 %v1903_v16  ;;  %v1948_v34 = vld [vmem:[%s2182_s9] ss:$0 sm:$0xff] }
   0xf   :  { %164 = vmatpush.msra.mxu3 %v1908_v17 }
  0x86   :  { %v86_v20 = vpop.f32.mrf.mxu0 }
  0x87   :  { %v113_v21 = vpop.f32.mrf.mxu1  ;;  %v87_v22 = vadd.f32 %v1915_v18, %v86_v20 }
  0x88   :  { %v114_v23 = vadd.f32 %v1920_v19, %v113_v21 }
  0x89   :  { %v89_v24 = vmax.f32 %v87_v22, 0.0 }
  0x8a   :  { %v116_v25 = vmax.f32 %v114_v23, 0.0 }
  0x8b   :  { %v169_v26 = vmul.f32 0.35355338, %v89_v24  ;;  %1563 = vmatmul.msk.f32.vlgmr.msra.gmra.mxu2 %vm65_vm0, %v89_v24 }
  0x8c   :  { %177 = vrot.lane.b32.xlu2 %v116_v25, %s1734_s6  ;;  %181 = vrot.lane.b32.xlu0 %v116_v25, %s1735_s3 }
  0x8d   :  { %1564 = vmatmul.msk.f32.vlgmr.msra.gmra.mxu3 %vm65_vm0, %v116_v25  ;;  %1565 = vmatpush.xpose.msk.msrb.mxu0 %vm203_vm1, %v116_v25 }
  0x8e   :  { %175 = vrot.lane.b32.xlu1 %v169_v26, %s1735_s3 }
  0x90   :  { %1566 = vmatmul.msk.f32.vlgmr.msrb.gmra.mxu0 %vm203_vm1, %v169_v26 }
  0x94   :  { %179 = vrot.lane.b32.xlu0 %v116_v25, %s1736_s5  ;;  %171 = vrot.lane.b32.xlu2 %v169_v26, %s1734_s6 }
  0x96   :  { %173 = vrot.lane.b32.xlu1 %v169_v26, %s1736_s5 }
  0xe6   :  { %v178_v27 = vpop.permute.xlu2 %177 }
  0xe7   :  { %1567 = vmatpush.xpose.msk.msrb.mxu1 %vm203_vm1, %v178_v27 }
  0xee   :  { %v172_v28 = vpop.permute.xlu2 %171 }
  0xef   :  { %1568 = vmatmul.msk.f32.vlgmr.msrb.gmra.mxu1 %vm203_vm1, %v172_v28 }
  0xfe   :  { %v182_v29 = vpop.permute.xlu0 %181 }
  0xff   :  { %1571 = vmatpush.xpose.msk.msrb.mxu3 %vm203_vm1, %v182_v29 }
 0x100   :  { %v176_v30 = vpop.permute.xlu1 %175 }
 0x102   :  { %1572 = vmatmul.msk.f32.vlgmr.msrb.gmra.mxu3 %vm203_vm1, %v176_v30 }
 0x106   :  { %v180_v31 = vpop.permute.xlu0 %179 }
 0x107   :  { %1569 = vmatpush.xpose.msk.msrb.mxu2 %vm203_vm1, %v180_v31 }
 0x108   :  { %v174_v32 = vpop.permute.xlu1 %173 }
 0x10a   :  { %1570 = vmatmul.msk.f32.vlgmr.msrb.gmra.mxu2 %vm203_vm1, %v174_v32 }
 0x10d   :  { %v225_v43 = vpop.f32.mrf.mxu0 }
 0x10e   :  { %v140_v35 = vpop.f32.mrf.mxu2  ;;  %v300_v45 = vsel %vm203_vm1, %v225_v43, -inf }
 0x10f   :  { %v1951_v37 = vadd.f32 %v1943_v33, %v140_v35 }
 0x110   :  { %v166_v36 = vpop.f32.mrf.mxu3 }
 0x111   :  { %v1954_v38 = vadd.f32 %v1948_v34, %v166_v36 }
 0x113   :  { %418 = vmatpush.msra.mxu0 %v1954_v38  ;;  %v1621_v47 = vpack.i.bf16 %v1951_v37, %v1954_v38 }
 0x115   :  { %542 = vmatpush.msrb.mxu0 %v1951_v37 }
 0x16c   :  { %v249_v39 = vpop.f32.mrf.mxu1 }
 0x16d   :  { %v303_v40 = vsel %vm203_vm1, %v249_v39, -inf }
 0x16e   :  { %304 = vmax.xlane.f32.xlu2 %v303_v40 }
 0x185   :  { %v297_v41 = vpop.f32.mrf.mxu3 }
 0x186   :  { %v309_v42 = vsel %vm203_vm1, %v297_v41, -inf }
 0x187   :  { %310 = vmax.xlane.f32.xlu0 %v309_v42 }
 0x18d   :  { %v273_v44 = vpop.f32.mrf.mxu2 }
 0x18e   :  { %v306_v46 = vsel %vm203_vm1, %v273_v44, -inf }
 0x18f   :  { %301 = vmax.xlane.f32.xlu0 %v300_v45  ;;  %307 = vmax.xlane.f32.xlu1 %v306_v46 }
 0x1a3   :  { %1622 = vrot.lane.b32.xlu0 %v1621_v47, %s1735_s3 }
 0x1a8   :  { %1627 = vrot.lane.b32.xlu1 %v1621_v47, %s1736_s5 }
 0x1e1   :  { %v305_v48 = vpop.xlane.xlu2 %304 }
 0x1e2   :  { %v313_v49 = vsub.f32 %v249_v39, %v305_v48 }
 0x1e4   :  { %v318_v50 = vmul.f32 1.442695, %v313_v49 }
 0x1e6   :  { %1650 = vpow2.f32 %v318_v50 }
 0x1ec   :  { %v1651_v51 = vpop.eup %1650 }
 0x1ed   :  { %v327_v52 = vsel %vm203_vm1, %v1651_v51, 0.0 }
 0x1ee   :  { %328 = vadd.xlane.f32.xlu2 %v327_v52 }
 0x1fa   :  { %v311_v53 = vpop.xlane.xlu0 %310 }
 0x1fb   :  { %v315_v54 = vsub.f32 %v297_v41, %v311_v53 }
 0x1fd   :  { %v322_v55 = vmul.f32 1.442695, %v315_v54 }
 0x1ff   :  { %1652 = vpow2.f32 %v322_v55 }
 0x202   :  { %v302_v56 = vpop.xlane.xlu0 %301  ;;  %v308_v57 = vpop.xlane.xlu1 %307 }
 0x203   :  { %v312_v58 = vsub.f32 %v225_v43, %v302_v56  ;;  %v314_v59 = vsub.f32 %v273_v44, %v308_v57 }
 0x205   :  { %v1967_v60 = vpop.eup %1652  ;;  %v316_v61 = vmul.f32 1.442695, %v312_v58  ;;  %v320_v62 = vmul.f32 1.442695, %v314_v59 }
 0x206   :  { %v333_v63 = vsel %vm203_vm1, %v1967_v60, 0.0 }
 0x207   :  { %1654 = vpow2.f32 %v316_v61  ;;  %334 = vadd.xlane.f32.xlu2 %v333_v63 }
 0x208   :  { %1656 = vpow2.f32 %v320_v62 }
 0x20d   :  { %v1971_v8 = vpop.eup %1654 }
 0x20e   :  { %v1973_v11 = vpop.eup %1656  ;;  %v324_v20 = vsel %vm203_vm1, %v1971_v8, 0.0 }
 0x20f   :  { %v330_v21 = vsel %vm203_vm1, %v1973_v11, 0.0  ;;  %325 = vadd.xlane.f32.xlu0 %v324_v20 }
 0x210   :  { %331 = vadd.xlane.f32.xlu1 %v330_v21 }
 0x215   :  { %v1623_v22 = vpop.permute.xlu0 %1622 }
 0x216   :  { %v1625_v23 = vunpack.i.h.bf16 %v1623_v22  ;;  %v1624_v24 = vunpack.i.l.bf16 %v1623_v22 }
 0x218   :  { %487 = vmatpush.msra.mxu3 %v1624_v24 }
 0x21a   :  { %707 = vmatpush.msrb.mxu3 %v1625_v23  ;;  %v1628_v25 = vpop.permute.xlu1 %1627 }
 0x21b   :  { %v1630_v26 = vunpack.i.h.bf16 %v1628_v25  ;;  %v1629_v27 = vunpack.i.l.bf16 %v1628_v25 }
 0x21d   :  { %464 = vmatpush.msra.mxu2 %v1629_v27 }
 0x21f   :  { %652 = vmatpush.msrb.mxu2 %v1630_v26  ;;  %1632 = vrot.lane.b32.xlu2 %v1621_v47, %s1734_s6 }
 0x261   :  { %v329_v28 = vpop.xlane.xlu2 %328 }
 0x262   :  { %1658 = vrcp.f32 %v329_v28  ;;  %v361_v32 = vand.u32 2147483648, %v329_v28  ;;  %v359_v36 = vand.u32 2147483647, %v329_v28  ;;  %vm355_vm3 = vweird.f32 %v329_v28 }
 0x264   :  { %v362_v40 = vor.u32 1.1754944e-38, %v361_v32  ;;  %vm360_vm5 = vcmp.eq.f32.partialorder %v359_v36, 8.507059e+37 }
 0x268   :  { %v1659_v29 = vpop.eup %1658 }
 0x269   :  { %v351_v30 = vmul.f32 %v1659_v29, %v329_v28  ;;  %vm356_vm2 = vweird.f32 %v1659_v29 }
 0x26a   :  { %vm357_vm4 = vmor %vm355_vm3, %vm356_vm2 }
 0x26b   :  { %v352_v31 = vsub.f32 1.0, %v351_v30 }
 0x26d   :  { %v353_v35 = vmul.f32 %v1659_v29, %v352_v31 }
 0x26f   :  { %v354_v39 = vadd.f32 %v1659_v29, %v353_v35 }
 0x271   :  { %v358_v41 = vsel %vm357_vm4, %v1659_v29, %v354_v39  ;;  %vm725_vm4 = vcmask 130048  }
 0x272   :  { %v363_v42 = vsel %vm360_vm5, %v362_v40, %v358_v41  ;;  %vm727_vm5 = vcmask 195584  }
 0x273   :  { %v393_v43 = vmul.f32 %v1651_v51, %v363_v42 }
 0x275   :  { %397 = vst.msk [vmem:[%s2185_s12 + $0x8] sm:$0xff] %vm203_vm1, %v393_v43  ;;  %547 = vxpose.xlu0.b32.start.end [1/1] (short) (narrow) %v393_v43, 8 }
 0x27a   :  { %v335_v44 = vpop.xlane.xlu2 %334 }
 0x27b   :  { %1660 = vrcp.f32 %v335_v44  ;;  %v389_v54 = vand.u32 2147483648, %v335_v44  ;;  %v387_v55 = vand.u32 2147483647, %v335_v44  ;;  %vm383_vm7 = vweird.f32 %v335_v44 }
 0x27d   :  { %v390_v58 = vor.u32 1.1754944e-38, %v389_v54  ;;  %vm388_vm9 = vcmp.eq.f32.partialorder %v387_v55, 8.507059e+37 }
 0x281   :  { %v1661_v45 = vpop.eup %1660 }
 0x282   :  { %v379_v46 = vmul.f32 %v1661_v45, %v335_v44  ;;  %v1633_v47 = vpop.permute.xlu2 %1632  ;;  %v326_v48 = vpop.xlane.xlu0 %325  ;;  %vm384_vm6 = vweird.f32 %v1661_v45 }
 0x283   :  { %v1635_v49 = vunpack.i.h.bf16 %v1633_v47  ;;  %v1634_v50 = vunpack.i.l.bf16 %v1633_v47  ;;  %v332_v52 = vpop.xlane.xlu1 %331  ;;  %1662 = vrcp.f32 %v326_v48  ;;  %vm385_vm8 = vmor %vm383_vm7, %vm384_vm6  ;;  %v347_v24 = vand.u32 2147483648, %v326_v48 }
 0x284   :  { %v380_v53 = vsub.f32 1.0, %v379_v46  ;;  %1664 = vrcp.f32 %v332_v52  ;;  %v375_v25 = vand.u32 2147483648, %v332_v52  ;;  %v345_v27 = vand.u32 2147483647, %v326_v48 }
 0x285   :  { %441 = vmatpush.msra.mxu1 %v1634_v50  ;;  %v373_v29 = vand.u32 2147483647, %v332_v52  ;;  %vm341_vm12 = vweird.f32 %v326_v48  ;;  %vm369_vm13 = vweird.f32 %v332_v52  ;;  %v348_v30 = vor.u32 1.1754944e-38, %v347_v24 }
 0x286   :  { %v381_v51 = vmul.f32 %v1661_v45, %v380_v53  ;;  %1574 = vmatmul.msk.f32.vlgmr.msra.gmra.mxu1 %vm203_vm1, %v393_v43  ;;  %v376_v32 = vor.u32 1.1754944e-38, %v375_v25  ;;  %vm346_vm15 = vcmp.eq.f32.partialorder %v345_v27, 8.507059e+37 }
 0x287   :  { %597 = vmatpush.msrb.mxu1 %v1635_v49  ;;  %vm374_vm3 = vcmp.eq.f32.partialorder %v373_v29, 8.507059e+37 }
 0x288   :  { %v382_v56 = vadd.f32 %v1661_v45, %v381_v51 }
 0x289   :  { %786 = vmatpush.msra.mxu1 %v1816_v1  ;;  %v1663_v57 = vpop.eup %1662 }
 0x28a   :  { %v1665_v59 = vpop.eup %1664  ;;  %v337_v61 = vmul.f32 %v1663_v57, %v326_v48  ;;  %v386_v62 = vsel %vm385_vm8, %v1661_v45, %v382_v56  ;;  %vm342_vm10 = vweird.f32 %v1663_v57 }
 0x28b   :  { %787 = vmatpush.msra.mxu1 %v1828_v3  ;;  %v365_v63 = vmul.f32 %v1665_v59, %v332_v52  ;;  %v391_v20 = vsel %vm388_vm9, %v390_v58, %v386_v62  ;;  %vm370_vm11 = vweird.f32 %v1665_v59  ;;  %vm343_vm14 = vmor %vm341_vm12, %vm342_vm10 }
 0x28c   :  { %v338_v21 = vsub.f32 1.0, %v337_v61  ;;  %v395_v22 = vmul.f32 %v1967_v60, %v391_v20  ;;  %vm371_vm2 = vmor %vm369_vm13, %vm370_vm11 }
 0x28d   :  { %788 = vmatpush.msra.mxu1 %v1838_v5  ;;  %v366_v23 = vsub.f32 1.0, %v365_v63 }
 0x28e   :  { %v339_v26 = vmul.f32 %v1663_v57, %v338_v21  ;;  %399 = vst.msk [vmem:[%s2185_s12 + $0x18] sm:$0xff] %vm203_vm1, %v395_v22  ;;  %657 = vxpose.xlu1.b32.start.end [1/1] (short) (narrow) %v395_v22, 8  ;;  %1576 = vmatmul.msk.f32.vlgmr.msra.gmra.mxu3 %vm203_vm1, %v395_v22 }
 0x28f   :  { %v367_v28 = vmul.f32 %v1665_v59, %v366_v23  ;;  %839 = vmatpush.msra.mxu3 %v1816_v1  ;;  %789 = vmatpush.msra.mxu1 %v1848_v7 }
 0x290   :  { %v340_v60 = vadd.f32 %v1663_v57, %v339_v26 }
 0x291   :  { %v368_v31 = vadd.f32 %v1665_v59, %v367_v28  ;;  %840 = vmatpush.msra.mxu3 %v1828_v3 }
 0x292   :  { %v344_v35 = vsel %vm343_vm14, %v1663_v57, %v340_v60 }
 0x293   :  { %v349_v36 = vsel %vm346_vm15, %v348_v30, %v344_v35  ;;  %v372_v39 = vsel %vm371_vm2, %v1665_v59, %v368_v31  ;;  %841 = vmatpush.msra.mxu3 %v1838_v5 }
 0x294   :  { %v377_v40 = vsel %vm374_vm3, %v376_v32, %v372_v39  ;;  %v392_v41 = vmul.f32 %v1971_v8, %v349_v36 }
 0x295   :  { %v394_v42 = vmul.f32 %v1973_v11, %v377_v40  ;;  %842 = vmatpush.msra.mxu3 %v1848_v7 }
 0x296   :  { %396 = vst.msk [vmem:[%s2185_s12] sm:$0xff] %vm203_vm1, %v392_v41  ;;  %1573 = vmatmul.msk.f32.vlgmr.msra.gmra.mxu0 %vm203_vm1, %v392_v41 }
 0x297   :  { %602 = vxpose.xlu2.b32.start.end [1/1] (short) (narrow) %v394_v42, 8  ;;  %398 = vst.msk [vmem:[%s2185_s12 + $0x10] sm:$0xff] %vm203_vm1, %v394_v42  ;;  %1575 = vmatmul.msk.f32.vlgmr.msra.gmra.mxu2 %vm203_vm1, %v394_v42 }
 0x298   :  { %815 = vmatpush.msra.mxu2 %v1811_v0  ;;  %761 = vmatpush.msra.mxu0 %v1811_v0 }
 0x29a   :  { %816 = vmatpush.msra.mxu2 %v1821_v2  ;;  %762 = vmatpush.msra.mxu0 %v1821_v2 }
 0x29c   :  { %817 = vmatpush.msra.mxu2 %v1833_v4  ;;  %763 = vmatpush.msra.mxu0 %v1833_v4 }
 0x29e   :  { %818 = vmatpush.msra.mxu2 %v1843_v6  ;;  %764 = vmatpush.msra.mxu0 %v1843_v6 }
 0x29f   :  { %492 = vxpose.xlu2.b32.start.end [1/1] (short) (narrow) %v392_v41, 8 }
 0x303   :  { %v443_v8 = vpop.f32.mrf.mxu1 }
 0x308   :  { %713 = vrot.lane.b32.xlu2 %v443_v8, %s1737_s30 }
 0x311   :  { %v489_v44 = vpop.f32.mrf.mxu3 }
 0x313   :  { %v420_v48 = vpop.f32.mrf.mxu0 }
 0x319   :  { %v563_v11 = vpop.trf.xlu0 }
 0x31a   :  { %v466_v43 = vpop.f32.mrf.mxu2  ;;  %1578 = vmatmul.msk.f32.vlgmr.msrb.gmra.mxu1 %vm203_vm1, %v563_v11 }
 0x31b   :  { %717 = vrot.lane.b32.xlu1 %v466_v43, %s1738_s13  ;;  %886 = vmatpush.msrb.mxu1 %v1863_v10  ;;  %v1583_v10 = vld [vmem:[%s2173_s0 + $0x8] sm:$0xff] }
 0x31d   :  { %887 = vmatpush.msrb.mxu1 %v1884_v13  ;;  %v1584_v13 = vld [vmem:[%s2174_s1 + $0x8] sm:$0xff] }
 0x31f   :  { %888 = vmatpush.msrb.mxu1 %v1896_v15 }
 0x321   :  { %889 = vmatpush.msrb.mxu1 %v1908_v17 }
 0x323   :  { %721 = vrot.lane.b32.xlu1 %v489_v44, %s1739_s14 }
 0x330   :  { %v618_v45 = vpop.trf.xlu2 }
 0x331   :  { %1579 = vmatmul.msk.f32.vlgmr.msrb.gmra.mxu2 %vm203_vm1, %v618_v45 }
 0x332   :  { %v673_v46 = vpop.trf.xlu1 }
 0x333   :  { %1580 = vmatmul.msk.f32.vlgmr.msrb.gmra.mxu3 %vm203_vm1, %v673_v46 }
 0x338   :  { %v508_v15 = vpop.trf.xlu2 }
 0x339   :  { %1585 = vmatmul.msk.f32.vlgmr.msra.gmra.mxu2 %vm65_vm0, %v1583_v10  ;;  %1577 = vmatmul.msk.f32.vlgmr.msrb.gmra.mxu0 %vm203_vm1, %v508_v15 }
 0x33a   :  { %863 = vmatpush.msrb.mxu0 %v1858_v9 }
 0x33b   :  { %1586 = vmatmul.msk.f32.vlgmr.msra.gmra.mxu3 %vm65_vm0, %v1584_v13 }
 0x33c   :  { %864 = vmatpush.msrb.mxu0 %v1879_v12 }
 0x33e   :  { %865 = vmatpush.msrb.mxu0 %v1891_v14 }
 0x340   :  { %866 = vmatpush.msrb.mxu0 %v1903_v16 }
 0x362   :  { %v714_v47 = vpop.permute.xlu2 %713 }
 0x363   :  { %v724_v49 = vsel %vm203_vm1, %v420_v48, %v714_v47 }
 0x38d   :  { %v718_v17 = vpop.permute.xlu1 %717 }
 0x38e   :  { %v726_v50 = vsel %vm725_vm4, %v724_v49, %v718_v17 }
 0x395   :  { %v722_v52 = vpop.permute.xlu1 %721 }
 0x396   :  { %v728_v9 = vsel %vm727_vm5, %v726_v50, %v722_v52 }
 0x397   :  { %v729_v53 = vadd.f32 %v728_v9, %v1951_v37  ;;  %v599_v54 = vpop.f32.mrf.mxu1 }
 0x398   :  { %731 = vrot.lane.b32.xlu0 %v599_v54, %s1737_s30 }
 0x399   :  { %1581 = vmatmul.msk.f32.vlgmr.msra.gmra.mxu0 %vm65_vm0, %v729_v53 }
 0x3b4   :  { %v654_v12 = vpop.f32.mrf.mxu2 }
 0x3b5   :  { %735 = vrot.lane.b32.xlu1 %v654_v12, %s1738_s13 }
 0x3b6   :  { %v709_v14 = vpop.f32.mrf.mxu3  ;;  %v544_v59 = vpop.f32.mrf.mxu0 }
 0x3b7   :  { %739 = vrot.lane.b32.xlu2 %v709_v14, %s1739_s14 }
 0x3bc   :  { %v820_v16 = vpop.f32.mrf.mxu2 }
 0x3bd   :  { %v821_v51 = vadd.f32 %v1915_v18, %v820_v16 }
 0x3be   :  { %v844_v55 = vpop.f32.mrf.mxu3 }
 0x3bf   :  { %v823_v56 = vmax.f32 %v821_v51, 0.0  ;;  %v845_v57 = vadd.f32 %v1920_v19, %v844_v55 }
 0x3c1   :  { %v894_v58 = vmul.f32 0.35355338, %v823_v56  ;;  %v847_v37 = vmax.f32 %v845_v57, 0.0  ;;  %1587 = vmatmul.msk.f32.vlgmr.msrb.gmra.mxu0 %vm65_vm0, %v823_v56 }
 0x3c3   :  { %896 = vrot.lane.b32.xlu2 %v894_v58, %s1734_s6  ;;  %902 = vrot.lane.b32.xlu1 %v847_v37, %s1734_s6 }
 0x3c4   :  { %1589 = vmatpush.xpose.msk.msrb.mxu2 %vm203_vm1, %v847_v37 }
 0x3c7   :  { %1590 = vmatmul.msk.f32.vlgmr.msrb.gmra.mxu2 %vm203_vm1, %v894_v58 }
 0x3cb   :  { %906 = vrot.lane.b32.xlu2 %v847_v37, %s1735_s3  ;;  %904 = vrot.lane.b32.xlu1 %v847_v37, %s1736_s5 }
 0x3d3   :  { %898 = vrot.lane.b32.xlu1 %v894_v58, %s1736_s5  ;;  %900 = vrot.lane.b32.xlu2 %v894_v58, %s1735_s3 }
 0x40a   :  { %v732_v22 = vpop.permute.xlu0 %731 }
 0x40b   :  { %v742_v23 = vsel %vm203_vm1, %v544_v59, %v732_v22 }
 0x411   :  { %v740_v20 = vpop.permute.xlu2 %739 }
 0x416   :  { %v766_v61 = vpop.f32.mrf.mxu0 }
 0x417   :  { %v767_v62 = vadd.f32 %v1915_v18, %v766_v61 }
 0x419   :  { %v769_v63 = vmax.f32 %v767_v62, 0.0 }
 0x41b   :  { %770 = vst.msk [vmem:[#allocation2] sm:$0xff] %vm65_vm0, %v769_v63 }
 0x41d   :  { %v897_v21 = vpop.permute.xlu2 %896 }
 0x425   :  { %v907_v28 = vpop.permute.xlu2 %906 }
 0x427   :  { %v736_v24 = vpop.permute.xlu1 %735 }
 0x428   :  { %v743_v25 = vsel %vm725_vm4, %v742_v23, %v736_v24 }
 0x429   :  { %v744_v26 = vsel %vm727_vm5, %v743_v25, %v740_v20 }
 0x42a   :  { %v745_v27 = vadd.f32 %v744_v26, %v1954_v38 }
 0x42c   :  { %1582 = vmatmul.msk.f32.vlgmr.msra.gmra.mxu1 %vm65_vm0, %v745_v27 }
 0x42d   :  { %1595 = vmatpush.xpose.msk.msra.mxu1 %vm203_vm1, %v907_v28  ;;  %v901_v60 = vpop.permute.xlu2 %900 }
 0x434   :  { %1588 = vmatmul.msk.f32.vlgmr.msrb.gmra.mxu1 %vm65_vm0, %v847_v37 }
 0x435   :  { %v903_v29 = vpop.permute.xlu1 %902 }
 0x436   :  { %1591 = vmatpush.xpose.msk.msrb.mxu3 %vm203_vm1, %v903_v29 }
 0x439   :  { %1592 = vmatmul.msk.f32.vlgmr.msrb.gmra.mxu3 %vm203_vm1, %v897_v21 }
 0x43c   :  { %1596 = vmatmul.msk.f32.vlgmr.msra.gmra.mxu1 %vm203_vm1, %v901_v60 }
 0x43d   :  { %v905_v30 = vpop.permute.xlu1 %904 }
 0x43e   :  { %1593 = vmatpush.xpose.msk.msra.mxu0 %vm203_vm1, %v905_v30  ;;  %v868_v36 = vpop.f32.mrf.mxu0 }
 0x43f   :  { %v2081_v41 = vadd.f32 %v1943_v33, %v868_v36 }
 0x445   :  { %v899_v31 = vpop.permute.xlu1 %898 }
 0x446   :  { %1594 = vmatmul.msk.f32.vlgmr.msra.gmra.mxu0 %vm203_vm1, %v899_v31 }
 0x44a   :  { %v949_v44 = vpop.f32.mrf.mxu2 }
 0x44b   :  { %v1024_v33 = vsel %vm203_vm1, %v949_v44, -inf }
 0x4a9   :  { %v791_v38 = vpop.f32.mrf.mxu1 }
 0x4aa   :  { %v792_v32 = vadd.f32 %v1920_v19, %v791_v38 }
 0x4ac   :  { %v794_v35 = vmax.f32 %v792_v32, 0.0 }
 0x4ae   :  { %795 = vst.msk [vmem:[#allocation4] sm:$0xff] %vm65_vm0, %v794_v35 }
 0x4b1   :  { %v891_v39 = vpop.f32.mrf.mxu1 }
 0x4b2   :  { %v2078_v40 = vadd.f32 %v1948_v34, %v891_v39 }
 0x4b4   :  { %1143 = vmatpush.msra.mxu2 %v2078_v40  ;;  %v1636_v16 = vpack.i.bf16 %v2081_v41, %v2078_v40 }
 0x4b6   :  { %1267 = vmatpush.msrb.mxu2 %v2081_v41 }
 0x4b9   :  { %v1021_v42 = vpop.f32.mrf.mxu1 }
 0x4ba   :  { %v1033_v8 = vsel %vm203_vm1, %v1021_v42, -inf }
 0x4bb   :  { %1034 = vmax.xlane.f32.xlu2 %v1033_v8 }
 0x4bc   :  { %v973_v11 = vpop.f32.mrf.mxu3 }
 0x4bd   :  { %v1027_v43 = vsel %vm203_vm1, %v973_v11, -inf }
 0x4be   :  { %1028 = vmax.xlane.f32.xlu1 %v1027_v43 }
 0x4c3   :  { %v997_v45 = vpop.f32.mrf.mxu0 }
 0x4c4   :  { %v1030_v34 = vsel %vm203_vm1, %v997_v45, -inf }
 0x4c5   :  { %1031 = vmax.xlane.f32.xlu0 %v1030_v34 }
 0x4c6   :  { %1025 = vmax.xlane.f32.xlu1 %v1024_v33 }
 0x52e   :  { %v1035_v46 = vpop.xlane.xlu2 %1034 }
 0x52f   :  { %v1039_v10 = vsub.f32 %v1021_v42, %v1035_v46 }
 0x531   :  { %v1046_v13 = vmul.f32 1.442695, %v1039_v10  ;;  %v1029_v15 = vpop.xlane.xlu1 %1028 }
 0x532   :  { %v1037_v17 = vsub.f32 %v973_v11, %v1029_v15 }
 0x533   :  { %1666 = vpow2.f32 %v1046_v13 }
 0x534   :  { %v1042_v47 = vmul.f32 1.442695, %v1037_v17 }
 0x536   :  { %1668 = vpow2.f32 %v1042_v47 }
 0x538   :  { %v1032_v48 = vpop.xlane.xlu0 %1031 }
 0x539   :  { %v1667_v49 = vpop.eup %1666  ;;  %v1038_v50 = vsub.f32 %v997_v45, %v1032_v48  ;;  %v1026_v51 = vpop.xlane.xlu1 %1025 }
 0x53a   :  { %v1057_v52 = vsel %vm203_vm1, %v1667_v49, 0.0  ;;  %v1036_v55 = vsub.f32 %v949_v44, %v1026_v51 }
 0x53b   :  { %v1044_v9 = vmul.f32 1.442695, %v1038_v50  ;;  %1058 = vadd.xlane.f32.xlu1 %v1057_v52 }
 0x53c   :  { %v2090_v53 = vpop.eup %1668  ;;  %v1040_v56 = vmul.f32 1.442695, %v1036_v55 }
 0x53d   :  { %1670 = vpow2.f32 %v1044_v9  ;;  %v1051_v54 = vsel %vm203_vm1, %v2090_v53, 0.0 }
 0x53e   :  { %1052 = vadd.xlane.f32.xlu0 %v1051_v54  ;;  %1672 = vpow2.f32 %v1040_v56 }
 0x543   :  { %v2094_v12 = vpop.eup %1670 }
 0x544   :  { %v1054_v14 = vsel %vm203_vm1, %v2094_v12, 0.0  ;;  %v2106_v57 = vpop.eup %1672 }
 0x545   :  { %1055 = vadd.xlane.f32.xlu2 %v1054_v14  ;;  %v1048_v58 = vsel %vm203_vm1, %v2106_v57, 0.0 }
 0x552   :  { %1637 = vrot.lane.b32.xlu0 %v1636_v16, %s1734_s6 }
 0x554   :  { %925 = vrot.lane.b32.xlu1 %v2078_v40, %s1735_s3 }
 0x55d   :  { %1642 = vrot.lane.b32.xlu2 %v1636_v16, %s1736_s5 }
 0x565   :  { %915 = vrot.lane.b32.xlu2 %v2081_v41, %s1735_s3 }
 0x57c   :  { %1049 = vadd.xlane.f32.xlu0 %v1048_v58 }
 0x5ae   :  { %v1059_v37 = vpop.xlane.xlu1 %1058 }
 0x5af   :  { %1674 = vrcp.f32 %v1059_v37  ;;  %v1113_v22 = vand.u32 2147483648, %v1059_v37  ;;  %v1111_v25 = vand.u32 2147483647, %v1059_v37  ;;  %vm1107_vm7 = vweird.f32 %v1059_v37 }
 0x5b1   :  { %v1053_v59 = vpop.xlane.xlu0 %1052  ;;  %v1114_v29 = vor.u32 1.1754944e-38, %v1113_v22  ;;  %vm1112_vm10 = vcmp.eq.f32.partialorder %v1111_v25, 8.507059e+37 }
 0x5b2   :  { %1676 = vrcp.f32 %v1053_v59  ;;  %v1085_v27 = vand.u32 2147483648, %v1053_v59  ;;  %v1083_v30 = vand.u32 2147483647, %v1053_v59  ;;  %vm1079_vm11 = vweird.f32 %v1053_v59 }
 0x5b4   :  { %v1086_v36 = vor.u32 1.1754944e-38, %v1085_v27  ;;  %vm1084_vm13 = vcmp.eq.f32.partialorder %v1083_v30, 8.507059e+37 }
 0x5b5   :  { %v1675_v61 = vpop.eup %1674 }
 0x5b6   :  { %v1103_v62 = vmul.f32 %v1675_v61, %v1059_v37  ;;  %vm1108_vm6 = vweird.f32 %v1675_v61 }
 0x5b7   :  { %vm1109_vm8 = vmor %vm1107_vm7, %vm1108_vm6 }
 0x5b8   :  { %v1677_v63 = vpop.eup %1676  ;;  %v1104_v20 = vsub.f32 1.0, %v1103_v62  ;;  %v1056_v21 = vpop.xlane.xlu2 %1055 }
 0x5b9   :  { %v1075_v23 = vmul.f32 %v1677_v63, %v1053_v59  ;;  %1678 = vrcp.f32 %v1056_v21  ;;  %vm1080_vm9 = vweird.f32 %v1677_v63  ;;  %v1099_v33 = vand.u32 2147483648, %v1056_v21 }
 0x5ba   :  { %v1105_v24 = vmul.f32 %v1675_v61, %v1104_v20  ;;  %vm1081_vm12 = vmor %vm1079_vm11, %vm1080_vm9  ;;  %v1097_v15 = vand.u32 2147483647, %v1056_v21  ;;  %vm1093_vm15 = vweird.f32 %v1056_v21 }
 0x5bb   :  { %v1076_v26 = vsub.f32 1.0, %v1075_v23  ;;  %v1100_v50 = vor.u32 1.1754944e-38, %v1099_v33 }
 0x5bc   :  { %v1106_v28 = vadd.f32 %v1675_v61, %v1105_v24  ;;  %vm1098_vm3 = vcmp.eq.f32.partialorder %v1097_v15, 8.507059e+37 }
 0x5bd   :  { %v1077_v60 = vmul.f32 %v1677_v63, %v1076_v26 }
 0x5be   :  { %v1110_v31 = vsel %vm1109_vm8, %v1675_v61, %v1106_v28 }
 0x5bf   :  { %v1679_v38 = vpop.eup %1678  ;;  %v1115_v32 = vsel %vm1112_vm10, %v1114_v29, %v1110_v31  ;;  %v1078_v35 = vadd.f32 %v1677_v63, %v1077_v60 }
 0x5c0   :  { %v1089_v39 = vmul.f32 %v1679_v38, %v1056_v21  ;;  %v1643_v42 = vpop.permute.xlu2 %1642  ;;  %v1119_v8 = vmul.f32 %v1667_v49, %v1115_v32  ;;  %vm1094_vm14 = vweird.f32 %v1679_v38 }
 0x5c1   :  { %v1645_v11 = vunpack.i.h.bf16 %v1643_v42  ;;  %v1644_v43 = vunpack.i.l.bf16 %v1643_v42  ;;  %v1082_v44 = vsel %vm1081_vm12, %v1677_v63, %v1078_v35  ;;  %vm1095_vm2 = vmor %vm1093_vm15, %vm1094_vm14 }
 0x5c2   :  { %v1090_v45 = vsub.f32 1.0, %v1089_v39  ;;  %1600 = vst.msk [vmem:[%s2185_s12 + $0x38] sm:$0xff] %vm203_vm1, %v1119_v8  ;;  %1382 = vxpose.xlu0.b32.start.end [1/1] (short) (narrow) %v1119_v8, 8  ;;  %v1087_v34 = vsel %vm1084_vm13, %v1086_v36, %v1082_v44 }
 0x5c3   :  { %1189 = vmatpush.msrb.mxu0 %v1644_v43  ;;  %v1117_v46 = vmul.f32 %v2090_v53, %v1087_v34 }
 0x5c4   :  { %v1091_v10 = vmul.f32 %v1679_v38, %v1090_v45  ;;  %v1638_v13 = vpop.permute.xlu0 %1637 }
 0x5c5   :  { %1377 = vmatpush.msra.mxu0 %v1645_v11  ;;  %v1640_v17 = vunpack.i.h.bf16 %v1638_v13  ;;  %v1639_v47 = vunpack.i.l.bf16 %v1638_v13  ;;  %1598 = vst.msk [vmem:[%s2185_s12 + $0x28] sm:$0xff] %vm203_vm1, %v1117_v46  ;;  %1272 = vxpose.xlu1.b32.start.end [1/1] (short) (narrow) %v1117_v46, 8 }
 0x5c6   :  { %v926_v48 = vpop.permute.xlu1 %925  ;;  %v1092_v49 = vadd.f32 %v1679_v38, %v1091_v10 }
 0x5c7   :  { %1212 = vmatpush.msrb.mxu1 %v926_v48  ;;  %1166 = vmatpush.msra.mxu3 %v1639_v47 }
 0x5c8   :  { %1604 = vmatmul.msk.f32.vlgmr.msrb.gmra.mxu1 %vm203_vm1, %v1119_v8  ;;  %v916_v52 = vpop.permute.xlu2 %915  ;;  %1602 = vmatmul.msk.f32.vlgmr.msra.gmra.mxu3 %vm203_vm1, %v1117_v46  ;;  %v1096_v9 = vsel %vm1095_vm2, %v1679_v38, %v1092_v49 }
 0x5c9   :  { %1322 = vmatpush.msrb.mxu3 %v1640_v17  ;;  %1432 = vmatpush.msra.mxu1 %v916_v52  ;;  %v1101_v53 = vsel %vm1098_vm3, %v1100_v50, %v1096_v9 }
 0x5ca   :  { %v1118_v54 = vmul.f32 %v2094_v12, %v1101_v53 }
 0x5cb   :  { %1510 = vmatpush.msra.mxu3 %v1816_v1 }
 0x5cc   :  { %1599 = vst.msk [vmem:[%s2185_s12 + $0x30] sm:$0xff] %vm203_vm1, %v1118_v54  ;;  %1327 = vxpose.xlu2.b32.start.end [1/1] (short) (narrow) %v1118_v54, 8  ;;  %1603 = vmatmul.msk.f32.vlgmr.msrb.gmra.mxu0 %vm203_vm1, %v1118_v54 }
 0x5cd   :  { %1511 = vmatpush.msra.mxu3 %v1828_v3 }
 0x5cf   :  { %1512 = vmatpush.msra.mxu3 %v1838_v5 }
 0x5d1   :  { %1513 = vmatpush.msra.mxu3 %v1848_v7 }
 0x5ef   :  { %v1050_v14 = vpop.xlane.xlu0 %1049 }
 0x5f0   :  { %1680 = vrcp.f32 %v1050_v14  ;;  %v1071_v1 = vand.u32 2147483648, %v1050_v14  ;;  %v1069_v56 = vand.u32 2147483647, %v1050_v14  ;;  %vm1065_vm7 = vweird.f32 %v1050_v14 }
 0x5f2   :  { %v1072_v37 = vor.u32 1.1754944e-38, %v1071_v1  ;;  %vm1070_vm9 = vcmp.eq.f32.partialorder %v1069_v56, 8.507059e+37 }
 0x5f6   :  { %v1681_v16 = vpop.eup %1680 }
 0x5f7   :  { %v1061_v12 = vmul.f32 %v1681_v16, %v1050_v14  ;;  %vm1066_vm6 = vweird.f32 %v1681_v16 }
 0x5f8   :  { %vm1067_vm8 = vmor %vm1065_vm7, %vm1066_vm6 }
 0x5f9   :  { %v1062_v51 = vsub.f32 1.0, %v1061_v12 }
 0x5fb   :  { %v1063_v55 = vmul.f32 %v1681_v16, %v1062_v51 }
 0x5fd   :  { %v1064_v58 = vadd.f32 %v1681_v16, %v1063_v55 }
 0x5ff   :  { %v1068_v59 = vsel %vm1067_vm8, %v1681_v16, %v1064_v58 }
 0x600   :  { %v1073_v3 = vsel %vm1070_vm9, %v1072_v37, %v1068_v59 }
 0x601   :  { %v1116_v5 = vmul.f32 %v2106_v57, %v1073_v3 }
 0x603   :  { %1217 = vxpose.xlu2.b32.start.end [1/1] (short) (narrow) %v1116_v5, 8  ;;  %1597 = vst.msk [vmem:[%s2185_s12 + $0x20] sm:$0xff] %vm203_vm1, %v1116_v5  ;;  %1601 = vmatmul.msk.f32.vlgmr.msra.gmra.mxu2 %vm203_vm1, %v1116_v5  ;;  %s1740_s12 = smov [#allocation4]  }
 0x604   :  { %1484 = vmatpush.msra.mxu2 %v1811_v0  ;;  %s1538_s5 = sshll.u32 %s1740_s12, 4  ;;  %s1539_s5 = int_to_ptr.vmem [resolvable:$true] %s1538_s5 }
 0x606   :  { %1485 = vmatpush.msra.mxu2 %v1821_v2 }
 0x608   :  { %1486 = vmatpush.msra.mxu2 %v1833_v4 }
 0x60a   :  { %1487 = vmatpush.msra.mxu2 %v1843_v6 }
 0x645   :  { %v1214_v2 = vpop.f32.mrf.mxu1 }
 0x649   :  { %v1191_v7 = vpop.f32.mrf.mxu0 }
 0x64a   :  { %1442 = vrot.lane.b32.xlu0 %v1191_v7, %s1738_s13 }
 0x64b   :  { %v1168_v63 = vpop.f32.mrf.mxu3 }
 0x665   :  { %v1343_v57 = vpop.trf.xlu2 }
 0x666   :  { %1607 = vmatmul.msk.f32.vlgmr.msra.gmra.mxu0 %vm203_vm1, %v1343_v57  ;;  %v1398_v61 = vpop.trf.xlu0 }
 0x667   :  { %1608 = vmatmul.msk.f32.vlgmr.msra.gmra.mxu1 %vm203_vm1, %v1398_v61 }
 0x669   :  { %v1288_v62 = vpop.trf.xlu1 }
 0x66a   :  { %1606 = vmatmul.msk.f32.vlgmr.msrb.gmra.mxu3 %vm203_vm1, %v1288_v62 }
 0x66c   :  { %1438 = vrot.lane.b32.xlu2 %v1168_v63, %s1737_s30 }
 0x686   :  { %v1145_v21 = vpop.f32.mrf.mxu2 }
 0x69c   :  { %v1233_v0 = vpop.trf.xlu2 }
 0x69d   :  { %1605 = vmatmul.msk.f32.vlgmr.msrb.gmra.mxu2 %vm203_vm1, %v1233_v0 }
 0x6bc   :  { %v1443_v31 = vpop.permute.xlu0 %1442 }
 0x6c6   :  { %v1439_v23 = vpop.permute.xlu2 %1438 }
 0x6c7   :  { %v1449_v30 = vsel %vm203_vm1, %v1145_v21, %v1439_v23 }
 0x6c8   :  { %v1450_v32 = vsel %vm725_vm4, %v1449_v30, %v1443_v31 }
 0x6e3   :  { %v1379_v4 = vpop.f32.mrf.mxu0 }
 0x6e4   :  { %1458 = vrot.lane.b32.xlu1 %v1379_v4, %s1738_s13  ;;  %v1434_v6 = vpop.f32.mrf.mxu1 }
 0x6e5   :  { %1462 = vrot.lane.b32.xlu2 %v1434_v6, %s1739_s14 }
 0x6ed   :  { %v1324_v20 = vpop.f32.mrf.mxu3 }
 0x6ee   :  { %1454 = vrot.lane.b32.xlu1 %v1324_v20, %s1737_s30 }
 0x6f6   :  { %1446 = vrot.lane.b32.xlu1 %v1214_v2, %s1739_s14 }
 0x720   :  { %v1269_v24 = vpop.f32.mrf.mxu2 }
 0x73f   :  { %v1463_v26 = vpop.permute.xlu2 %1462 }
 0x756   :  { %v1459_v22 = vpop.permute.xlu1 %1458 }
 0x760   :  { %v1455_v25 = vpop.permute.xlu1 %1454 }
 0x761   :  { %v1465_v27 = vsel %vm203_vm1, %v1269_v24, %v1455_v25 }
 0x762   :  { %v1466_v28 = vsel %vm725_vm4, %v1465_v27, %v1459_v22 }
 0x763   :  { %v1467_v29 = vsel %vm727_vm5, %v1466_v28, %v1463_v26 }
 0x764   :  { %v1468_v60 = vadd.f32 %v1467_v29, %v2078_v40 }
 0x766   :  { %1610 = vmatmul.msk.f32.vlgmr.msra.gmra.mxu3 %vm65_vm0, %v1468_v60 }
 0x768   :  { %v1447_v38 = vpop.permute.xlu1 %1446 }
 0x769   :  { %v1451_v35 = vsel %vm727_vm5, %v1450_v32, %v1447_v38 }
 0x76a   :  { %v1452_v36 = vadd.f32 %v1451_v35, %v2081_v41 }
 0x76c   :  { %1609 = vmatmul.msk.f32.vlgmr.msra.gmra.mxu2 %vm65_vm0, %v1452_v36 }
 0x7e9   :  { %v1515_v39 = vpop.f32.mrf.mxu3 }
 0x7ea   :  { %v1516_v40 = vadd.f32 %v1920_v19, %v1515_v39 }
 0x7ec   :  { %v1518_v42 = vmax.f32 %v1516_v40, 0.0 }
 0x7ee   :  { %1520 = vst.msk [vmem:[#allocation4 + $0x8] sm:$0xff] %vm65_vm0, %v1518_v42 }
 0x7ef   :  { %v1489_v41 = vpop.f32.mrf.mxu2  ;;  %1546 = dma.vmem_to_hbm [thread:$0]  %s1539_s5, 256, %s1541_s23, [#allocation5], %s1742_s26, %s1742_s26, %s1737_s30  }
 0x7f0   :  { %v1490_v8 = vadd.f32 %v1915_v18, %v1489_v41 }
 0x7f2   :  { %v1492_v11 = vmax.f32 %v1490_v8, 0.0 }
 0x7f4   :  { %1494 = vst.msk [vmem:[#allocation2 + $0x8] sm:$0xff] %vm65_vm0, %v1492_v11 }
 0x7f5   :  { %1533 = dma.vmem_to_hbm [thread:$0]  %s1526_s7, 256, %s1528_s25, [#allocation3], %s1742_s26, %s1742_s26, %s1737_s30  }
 0x7f6   :  { %1730 = dma.done.wait [#allocation3], 256  }
 0x7f7   :  { %1731 = vsyncadd [#allocation3], 4294967040 }
 0x7f8   :  { %1732 = dma.done.wait [#allocation5], 256  }
 0x7f9   :  { %1733 = vsyncadd [#allocation5], 4294967040 }
 0x7fa   :  { %1559 = vsyncpa [#allocation3], 1 }
 0x7fb   :  { %1560 = vsyncpa [#allocation5], 1 }

</bundles_post_ra>
